<compile_context>
chip_gen: v7x
topology: tpu7x:2x2x1
jax: 0.10.0
libtpu: 0.0.40
codegen_flags: <defaults>
</compile_context>

<pallas_src>
import functools

import jax
import jax.numpy as jnp
from jax import lax
from jax.experimental import pallas as pl
from jax.experimental.pallas import tpu as pltpu


RMS_EPS = 1e-6   # TODO(synk): verify against the reference module's RMSNorm eps.
LN_EPS = 1e-5


# ----------------------------- in-kernel helpers -----------------------------
def _softplus(x):
    return jnp.where(x > 20.0, x, jnp.log1p(jnp.exp(jnp.minimum(x, 20.0))))


def _silu(x):
    return x * jax.nn.sigmoid(x)


# ------------------------------ fused model kernel ----------------------------
def _fused_mamba_kernel(x_ref,
                        rmsg_ref, win_ref, wconv_ref, bconv_ref,
                        wbcd_ref, dtb_ref, at_ref, d_ref, wout_ref,
                        lng_ref, lnb_ref, wcls_ref, bcls_ref,
                        o_ref,
                        apad_ref, ybuf_ref,
                        *, num_layers, d_model, d_state, ker_size):
    x = x_ref[0]                                              # (L, d_in) f32
    L = x.shape[0]
    pad_rows = apad_ref.shape[0] - L                          # aligned zero pad

    # Zero the conv padding region once per grid step (aligned 8-row store).
    apad_ref[pl.ds(0, pad_rows), :] = jnp.zeros((pad_rows, d_model), jnp.float32)

    for li in range(num_layers):
        # ---------------- RMSNorm pre-norm --------------------------------
        ms = jnp.mean(x * x, axis=-1, keepdims=True)
        xn = x * lax.rsqrt(ms + RMS_EPS) * rmsg_ref[li]

        # ---------------- in_proj -> (a | z) -------------------------------
        ab = jnp.dot(xn.astype(jnp.bfloat16), win_ref[li],
                     preferred_element_type=jnp.float32)      # (L, 2*dm) f32
        a = ab[:, :d_model]
        z = ab[:, d_model:]

        # ---------------- depthwise causal conv1d + SiLU -------------------
        apad_ref[pl.ds(pad_rows, L), :] = a                   # aligned store
        wconv = wconv_ref[li]                                 # (ker, dm)
        base = pad_rows - (ker_size - 1)
        conv = apad_ref[pl.ds(base, L), :] * wconv[0:1, :]
        for k in range(1, ker_size):
            conv = conv + apad_ref[pl.ds(base + k, L), :] * wconv[k:k + 1, :]
        u = _silu(conv + bconv_ref[li])                       # (L, dm)

        # ---------------- fused [B | C | dt] projection --------------------
        bcd = jnp.dot(u.astype(jnp.bfloat16), wbcd_ref[li],
                      preferred_element_type=jnp.float32)     # (L, 2*ds + dm)
        bmt = bcd[:, :d_state].T                              # (ds, L)
        cm = bcd[:, d_state:2 * d_state]                      # (L, ds)
        dt = _softplus(dtb_ref[li] + bcd[:, 2 * d_state:])    # (L, dm)
        du = dt * u                                           # (L, dm)
        at = at_ref[li]                                       # (ds, dm) = -A^T

        # ---------------- selective scan (state-major, per-step) -----------
        # h[s, d]; A_bar / X_bar built per timestep, never (L, dm, ds).
        h = jnp.zeros((d_state, d_model), jnp.float32)
        for t in range(L):                                    # L is small/static
            dt_row = dt[t:t + 1, :]                           # (1, dm)
            du_row = du[t:t + 1, :]                           # (1, dm)
            b_col = bmt[:, t:t + 1]                           # (ds, 1)
            c_row = cm[t:t + 1, :]                            # (1, ds)
            h = jnp.exp(dt_row * at) * h + b_col * du_row     # (ds, dm)
            ybuf_ref[pl.ds(t, 1), :] = jnp.dot(               # MXU matvec
                c_row, h, preferred_element_type=jnp.float32)

        y = ybuf_ref[...] + d_ref[li] * u                     # (L, dm) + skip

        # ---------------- gate, out_proj, residual -------------------------
        y = y * _silu(z)
        out = jnp.dot(y.astype(jnp.bfloat16), wout_ref[li],
                      preferred_element_type=jnp.float32)     # (L, d_in)
        x = out + x

    # -------------------- LayerNorm + classifier head ----------------------
    mu = jnp.mean(x, axis=-1, keepdims=True)
    var = jnp.mean((x - mu) ** 2, axis=-1, keepdims=True)
    xn = (x - mu) * lax.rsqrt(var + LN_EPS) * lng_ref[...] + lnb_ref[...]
    # TODO(synk): dropout is the identity in eval mode (no in-kernel RNG).
    logits = jnp.dot(xn.astype(jnp.bfloat16), wcls_ref[...],
                     preferred_element_type=jnp.float32) + bcls_ref[...]
    o_ref[0] = logits.astype(o_ref.dtype)                     # (L, 128) lane-dense


# --------------------------------- wrappers -----------------------------------
def _full_spec(arr):
    zeros = (0,) * arr.ndim
    return pl.BlockSpec(arr.shape, lambda b, _z=zeros: _z)


def _fused_forward(x, stacked, head, *, d_model, d_state, ker_size, n_lanes):
    B, L, d_in = x.shape
    num_layers = stacked['rms_g'].shape[0]
    pad_rows = max(8, ((ker_size - 1 + 7) // 8) * 8)

    weights = (stacked['rms_g'], stacked['w_in'], stacked['w_conv'],
               stacked['b_conv'], stacked['w_bcd'], stacked['dt_bias'],
               stacked['at'], stacked['d'], stacked['w_out'],
               head['ln_g'], head['ln_b'], head['w_cls'], head['b_cls'])

    kernel = functools.partial(_fused_mamba_kernel, num_layers=num_layers,
                               d_model=d_model, d_state=d_state,
                               ker_size=ker_size)

    return pl.pallas_call(
        kernel,
        out_shape=jax.ShapeDtypeStruct((B, L, n_lanes), jnp.float32),
        grid_spec=pltpu.PrefetchScalarGridSpec(
            num_scalar_prefetch=0,
            grid=(B,),
            in_specs=[pl.BlockSpec((1, L, d_in), lambda b: (b, 0, 0))]
                     + [_full_spec(w) for w in weights],
            out_specs=pl.BlockSpec((1, L, n_lanes), lambda b: (b, 0, 0)),
            scratch_shapes=[pltpu.VMEM((pad_rows + L, d_model), jnp.float32),
                            pltpu.VMEM((L, d_model), jnp.float32)]),
        compiler_params=pltpu.CompilerParams(
            dimension_semantics=("parallel",)),
    )(x, *weights)


@functools.partial(jax.jit, static_argnames=("d_model", "d_state", "ker_size"))
def mamba_for_token_classification(params, input_ids, attention_mask=None, *,
                                   d_model, d_state, ker_size):
    # embedding lookup (plain-JAX gather glue) + attention mask (as in spec)
    x = jnp.take(params['emb'], input_ids, axis=0)            # (B, L, d_input)
    if attention_mask is not None:
        x = x * attention_mask[..., None].astype(x.dtype)

    # --- stack per-layer weights along a leading layer axis (VMEM-resident) ---
    layers = params['layers']
    stack = lambda name: jnp.stack([l[name] for l in layers], axis=0)
    stacked = dict(
        rms_g=stack('rms_g'),
        w_in=stack('w_in').astype(jnp.bfloat16),
        w_conv=stack('w_conv'),
        b_conv=stack('b_conv'),
        # fused [B | C | dt] projection; W_dt = w_D1 @ w_D2 (low rank -> cheap)
        w_bcd=jnp.stack([jnp.concatenate(
            [l['w_B'], l['w_C'], jnp.dot(l['w_D1'], l['w_D2'])], axis=1)
            for l in layers], axis=0).astype(jnp.bfloat16),
        dt_bias=stack('dt_bias'),
        at=jnp.stack([-l['A'].T for l in layers], axis=0),    # pre-negated A^T
        d=stack('D'),
        w_out=stack('w_out').astype(jnp.bfloat16),
    )

    # --- head weights, classifier padded to a lane-dense 128-wide output ---
    num_labels = params['w_cls'].shape[1]
    d_input = params['w_cls'].shape[0]
    n_lanes = ((num_labels + 127) // 128) * 128
    w_cls_p = jnp.zeros((d_input, n_lanes), jnp.float32
                        ).at[:, :num_labels].set(params['w_cls']
                        ).astype(jnp.bfloat16)
    b_cls_p = jnp.zeros((1, n_lanes), jnp.float32
                        ).at[:, :num_labels].set(params['b_cls'])
    head = dict(ln_g=params['ln_g'], ln_b=params['ln_b'],
                w_cls=w_cls_p, b_cls=b_cls_p)

    logits_pad = _fused_forward(x, stacked, head, d_model=d_model,
                                d_state=d_state, ker_size=ker_size,
                                n_lanes=n_lanes)
    logits = logits_pad[..., :num_labels]
    return logits, None   # cache=None was passed -> new_cache is None


# ------------------------------- parameter init --------------------------------
def init_params(key, vocab_size, num_labels, num_layers, d_input, d_model,
                d_state, d_discr, ker_size):
    n = lambda k, shape: 0.02 * jax.random.normal(k, shape, jnp.float32)
    keys = jax.random.split(key, 2 + num_layers)
    params = {'emb': n(keys[0], (vocab_size, d_input))}

    layers = []
    for i in range(num_layers):
        k = jax.random.split(keys[2 + i], 7)
        layers.append(dict(
            rms_g=jnp.ones((1, d_input), jnp.float32),
            w_in=n(k[0], (d_input, 2 * d_model)),
            w_conv=n(k[1], (ker_size, d_model)),       # depthwise conv taps
            b_conv=jnp.zeros((1, d_model), jnp.float32),
            w_B=n(k[2], (d_model, d_state)),
            w_C=n(k[3], (d_model, d_state)),
            w_D1=n(k[4], (d_model, d_discr)),
            w_D2=n(k[5], (d_discr, d_model)),
            # dt bias kept separate from the SSM skip D (per review).
            dt_bias=jnp.zeros((1, d_model), jnp.float32),
            A=jnp.tile(jnp.arange(1, d_state + 1, dtype=jnp.float32)[None, :],
                       (d_model, 1)),
            D=jnp.ones((1, d_model), jnp.float32),
            w_out=n(k[6], (d_model, d_input)),
        ))
    params['layers'] = layers

    kh = jax.random.split(keys[1], 2)
    params['ln_g'] = jnp.ones((1, d_input), jnp.float32)
    params['ln_b'] = jnp.zeros((1, d_input), jnp.float32)
    params['w_cls'] = n(kh[0], (d_input, num_labels))
    params['b_cls'] = jnp.zeros((1, num_labels), jnp.float32)
    return params


# --------------------------- pure-JAX reference (f32) ---------------------------
def reference_forward(params, input_ids, attention_mask, *,
                      d_model, d_state, ker_size):
    x = jnp.take(params['emb'], input_ids, axis=0)
    if attention_mask is not None:
        x = x * attention_mask[..., None].astype(x.dtype)
    B, L, _ = x.shape
    for l in params['layers']:
        ms = jnp.mean(x * x, axis=-1, keepdims=True)
        xn = x * lax.rsqrt(ms + RMS_EPS) * l['rms_g']
        ab = jnp.dot(xn, l['w_in'])
        a, z = ab[..., :d_model], ab[..., d_model:]
        a_pad = jnp.pad(a, ((0, 0), (ker_size - 1, 0), (0, 0)))
        conv = jnp.zeros_like(a) + l['b_conv']
        for k in range(ker_size):
            conv = conv + a_pad[:, k:k + L, :] * l['w_conv'][k]
        u = _silu(conv)
        bm = jnp.dot(u, l['w_B'])
        cm = jnp.dot(u, l['w_C'])
        dt = _softplus(l['dt_bias'] + jnp.dot(jnp.dot(u, l['w_D1']), l['w_D2']))
        A = -l['A']
        h = jnp.zeros((B, d_model, d_state), jnp.float32)
        ys = []
        for t in range(L):
            a_bar = jnp.exp(dt[:, t, :, None] * A[None])
            x_bar = (dt[:, t] * u[:, t])[:, :, None] * bm[:, t, None, :]
            h = a_bar * h + x_bar
            ys.append(jnp.sum(h * cm[:, t, None, :], axis=-1))
        y = jnp.stack(ys, axis=1) + l['D'] * u
        y = y * _silu(z)
        x = jnp.dot(y, l['w_out']) + x
    mu = jnp.mean(x, axis=-1, keepdims=True)
    var = jnp.mean((x - mu) ** 2, axis=-1, keepdims=True)
    xn = (x - mu) * lax.rsqrt(var + LN_EPS) * params['ln_g'] + params['ln_b']
    return jnp.dot(xn, params['w_cls']) + params['b_cls'], None


# ------------------------------------ main --------------------------------------
if __name__ == "__main__":
    vocab_size, num_labels, num_layers = 100, 5, 2
    d_input, d_model, d_state, ker_size = 32, 64, 16, 4
    d_discr = d_model // 16
    B, L = 2, 8

    key = jax.random.PRNGKey(0)
    pkey, ikey = jax.random.split(key)
    params = init_params(pkey, vocab_size, num_labels, num_layers,
                         d_input, d_model, d_state, d_discr, ker_size)

    input_ids = jax.random.randint(ikey, (B, L), 0, vocab_size, dtype=jnp.int32)
    attention_mask = jnp.ones((B, L), jnp.int32).at[1, -1].set(0)

    logits, new_cache = mamba_for_token_classification(
        params, input_ids, attention_mask,
        d_model=d_model, d_state=d_state, ker_size=ker_size)
    jax.block_until_ready(logits)

    # correctness check against a pure-JAX f32 reference (bf16 MXU tolerance)
    ref_logits, _ = reference_forward(params, input_ids, attention_mask,
                                      d_model=d_model, d_state=d_state,
                                      ker_size=ker_size)
    assert logits.shape == (B, L, num_labels)
    assert new_cache is None
    err = float(jnp.max(jnp.abs(logits - ref_logits)))
    assert err < 1e-2, f"kernel vs reference mismatch: max abs err {err}"
    print("KERNEL_OK")
</pallas_src>

<mosaic_0001>
module attributes {stable_mosaic.version = 11 : i64} {
  func.func @_fused_mamba_kernel(%arg0: i32, %arg1: memref<1x8x32xf32, #tpu.memory_space<vmem>>, %arg2: memref<2x1x32xf32, #tpu.memory_space<vmem>>, %arg3: memref<2x32x128xbf16, #tpu.memory_space<vmem>>, %arg4: memref<2x4x64xf32, #tpu.memory_space<vmem>>, %arg5: memref<2x1x64xf32, #tpu.memory_space<vmem>>, %arg6: memref<2x64x96xbf16, #tpu.memory_space<vmem>>, %arg7: memref<2x1x64xf32, #tpu.memory_space<vmem>>, %arg8: memref<2x16x64xf32, #tpu.memory_space<vmem>>, %arg9: memref<2x1x64xf32, #tpu.memory_space<vmem>>, %arg10: memref<2x64x32xbf16, #tpu.memory_space<vmem>>, %arg11: memref<1x32xf32, #tpu.memory_space<vmem>>, %arg12: memref<1x32xf32, #tpu.memory_space<vmem>>, %arg13: memref<32x128xbf16, #tpu.memory_space<vmem>>, %arg14: memref<1x128xf32, #tpu.memory_space<vmem>>, %arg15: memref<1x8x128xf32, #tpu.memory_space<vmem>>, %arg16: memref<16x64xf32, #tpu.memory_space<vmem>>, %arg17: memref<8x64xf32, #tpu.memory_space<vmem>>) attributes {dimension_semantics = [#tpu.dimension_semantics<parallel>], iteration_bounds = array<i64: 2>, scalar_prefetch = 0 : i64, scratch_operands = 2 : i64, tpu.core_type = #tpu.core_type<tc>, window_params = [{transform_indices = @transform_0, window_bounds = array<i64: 1, 8, 32>}, {pipeline_mode = #tpu.pipeline_mode<synchronous>, transform_indices = @transform_1, window_bounds = array<i64: 2, 1, 32>}, {pipeline_mode = #tpu.pipeline_mode<synchronous>, transform_indices = @transform_2, window_bounds = array<i64: 2, 32, 128>}, {pipeline_mode = #tpu.pipeline_mode<synchronous>, transform_indices = @transform_3, window_bounds = array<i64: 2, 4, 64>}, {pipeline_mode = #tpu.pipeline_mode<synchronous>, transform_indices = @transform_4, window_bounds = array<i64: 2, 1, 64>}, {pipeline_mode = #tpu.pipeline_mode<synchronous>, transform_indices = @transform_5, window_bounds = array<i64: 2, 64, 96>}, {pipeline_mode = #tpu.pipeline_mode<synchronous>, transform_indices = @transform_6, window_bounds = array<i64: 2, 1, 64>}, {pipeline_mode = #tpu.pipeline_mode<synchronous>, transform_indices = @transform_7, window_bounds = array<i64: 2, 16, 64>}, {pipeline_mode = #tpu.pipeline_mode<synchronous>, transform_indices = @transform_8, window_bounds = array<i64: 2, 1, 64>}, {pipeline_mode = #tpu.pipeline_mode<synchronous>, transform_indices = @transform_9, window_bounds = array<i64: 2, 64, 32>}, {pipeline_mode = #tpu.pipeline_mode<synchronous>, transform_indices = @transform_10, window_bounds = array<i64: 1, 32>}, {pipeline_mode = #tpu.pipeline_mode<synchronous>, transform_indices = @transform_11, window_bounds = array<i64: 1, 32>}, {pipeline_mode = #tpu.pipeline_mode<synchronous>, transform_indices = @transform_12, window_bounds = array<i64: 32, 128>}, {pipeline_mode = #tpu.pipeline_mode<synchronous>, transform_indices = @transform_13, window_bounds = array<i64: 1, 128>}, {transform_indices = @transform_14, window_bounds = array<i64: 1, 8, 128>}]} {
    %c0 = arith.constant 0 : index
    %c0_0 = arith.constant 0 : index
    %c0_1 = arith.constant 0 : index
    %0 = vector.load %arg1[%c0, %c0_0, %c0_1] : memref<1x8x32xf32, #tpu.memory_space<vmem>>, vector<1x8x32xf32>
    %1 = vector.shape_cast %0 : vector<1x8x32xf32> to vector<8x32xf32>
    %cst = arith.constant 0.000000e+00 : f32
    %2 = vector.broadcast %cst : f32 to vector<8x64xf32>
    %c0_2 = arith.constant 0 : index
    %c0_3 = arith.constant 0 : index
    %3 = vector.load %arg16[%c0_2, %c0_3] : memref<16x64xf32, #tpu.memory_space<vmem>>, vector<8x64xf32>
    tpu.vector_store %arg16[%c0_2, %c0_3], %2 {strides = array<i32>} : memref<16x64xf32, #tpu.memory_space<vmem>>, vector<8x64xf32>,
    %4 = arith.mulf %1, %1 : vector<8x32xf32>
    %cst_4 = arith.constant dense<0.000000e+00> : vector<8xf32>
    %5 = vector.multi_reduction <add>, %4, %cst_4 [1] : vector<8x32xf32> to vector<8xf32>
    %6 = vector.shape_cast %5 : vector<8xf32> to vector<8x1xf32>
    %cst_5 = arith.constant 3.200000e+01 : f32
    %7 = vector.broadcast %cst_5 : f32 to vector<8x1xf32>
    %8 = arith.divf %6, %7 : vector<8x1xf32>
    %cst_6 = arith.constant 9.99999997E-7 : f32
    %9 = vector.broadcast %cst_6 : f32 to vector<8x1xf32>
    %10 = arith.addf %8, %9 : vector<8x1xf32>
    %11 = math.rsqrt %10 : vector<8x1xf32>
    %12 = vector.broadcast %11 : vector<8x1xf32> to vector<8x32xf32>
    %13 = arith.mulf %1, %12 : vector<8x32xf32>
    %c0_7 = arith.constant 0 : index
    %c0_8 = arith.constant 0 : index
    %c0_9 = arith.constant 0 : index
    %14 = vector.load %arg2[%c0_7, %c0_8, %c0_9] : memref<2x1x32xf32, #tpu.memory_space<vmem>>, vector<1x1x32xf32>
    %15 = vector.shape_cast %14 : vector<1x1x32xf32> to vector<1x32xf32>
    %16 = vector.broadcast %15 : vector<1x32xf32> to vector<8x32xf32>
    %17 = arith.mulf %13, %16 : vector<8x32xf32>
    %18 = arith.truncf %17 : vector<8x32xf32> to vector<8x32xbf16>
    %c0_10 = arith.constant 0 : index
    %c0_11 = arith.constant 0 : index
    %c0_12 = arith.constant 0 : index
    %19 = vector.load %arg3[%c0_10, %c0_11, %c0_12] : memref<2x32x128xbf16, #tpu.memory_space<vmem>>, vector<1x32x128xbf16>
    %20 = vector.shape_cast %19 : vector<1x32x128xbf16> to vector<32x128xbf16>
    %cst_13 = arith.constant dense<0.000000e+00> : vector<8x128xf32>
    %21 = tpu.matmul %18, %20, %cst_13 {dimension_numbers = #tpu.dot_dimension_numbers<[1], [0], [0], [1], [0, 0, 1, 1], [], []>} : vector<8x32xbf16>, vector<32x128xbf16>, vector<8x128xf32> -> vector<8x128xf32>
    %22 = vector.extract_strided_slice %21 {offsets = [0, 0], sizes = [8, 64], strides = [1, 1]} : vector<8x128xf32> to vector<8x64xf32>
    %23 = vector.extract_strided_slice %21 {offsets = [0, 64], sizes = [8, 64], strides = [1, 1]} : vector<8x128xf32> to vector<8x64xf32>
    %c8 = arith.constant 8 : index
    %c0_14 = arith.constant 0 : index
    %24 = vector.load %arg16[%c8, %c0_14] : memref<16x64xf32, #tpu.memory_space<vmem>>, vector<8x64xf32>
    tpu.vector_store %arg16[%c8, %c0_14], %22 {strides = array<i32>} : memref<16x64xf32, #tpu.memory_space<vmem>>, vector<8x64xf32>,
    %c0_15 = arith.constant 0 : index
    %c0_16 = arith.constant 0 : index
    %c0_17 = arith.constant 0 : index
    %25 = vector.load %arg4[%c0_15, %c0_16, %c0_17] : memref<2x4x64xf32, #tpu.memory_space<vmem>>, vector<1x4x64xf32>
    %26 = vector.shape_cast %25 : vector<1x4x64xf32> to vector<4x64xf32>
    %c5 = arith.constant 5 : index
    %c0_18 = arith.constant 0 : index
    %27 = vector.load %arg16[%c5, %c0_18] : memref<16x64xf32, #tpu.memory_space<vmem>>, vector<8x64xf32>
    %28 = vector.extract_strided_slice %26 {offsets = [0, 0], sizes = [1, 64], strides = [1, 1]} : vector<4x64xf32> to vector<1x64xf32>
    %29 = vector.broadcast %28 : vector<1x64xf32> to vector<8x64xf32>
    %30 = arith.mulf %27, %29 : vector<8x64xf32>
    %c6 = arith.constant 6 : index
    %c0_19 = arith.constant 0 : index
    %31 = vector.load %arg16[%c6, %c0_19] : memref<16x64xf32, #tpu.memory_space<vmem>>, vector<8x64xf32>
    %32 = vector.extract_strided_slice %26 {offsets = [1, 0], sizes = [1, 64], strides = [1, 1]} : vector<4x64xf32> to vector<1x64xf32>
    %33 = vector.broadcast %32 : vector<1x64xf32> to vector<8x64xf32>
    %34 = arith.mulf %31, %33 : vector<8x64xf32>
    %35 = arith.addf %30, %34 : vector<8x64xf32>
    %c7 = arith.constant 7 : index
    %c0_20 = arith.constant 0 : index
    %36 = vector.load %arg16[%c7, %c0_20] : memref<16x64xf32, #tpu.memory_space<vmem>>, vector<8x64xf32>
    %37 = vector.extract_strided_slice %26 {offsets = [2, 0], sizes = [1, 64], strides = [1, 1]} : vector<4x64xf32> to vector<1x64xf32>
    %38 = vector.broadcast %37 : vector<1x64xf32> to vector<8x64xf32>
    %39 = arith.mulf %36, %38 : vector<8x64xf32>
    %40 = arith.addf %35, %39 : vector<8x64xf32>
    %c8_21 = arith.constant 8 : index
    %c0_22 = arith.constant 0 : index
    %41 = vector.load %arg16[%c8_21, %c0_22] : memref<16x64xf32, #tpu.memory_space<vmem>>, vector<8x64xf32>
    %42 = vector.extract_strided_slice %26 {offsets = [3, 0], sizes = [1, 64], strides = [1, 1]} : vector<4x64xf32> to vector<1x64xf32>
    %43 = vector.broadcast %42 : vector<1x64xf32> to vector<8x64xf32>
    %44 = arith.mulf %41, %43 : vector<8x64xf32>
    %45 = arith.addf %40, %44 : vector<8x64xf32>
    %c0_23 = arith.constant 0 : index
    %c0_24 = arith.constant 0 : index
    %c0_25 = arith.constant 0 : index
    %46 = vector.load %arg5[%c0_23, %c0_24, %c0_25] : memref<2x1x64xf32, #tpu.memory_space<vmem>>, vector<1x1x64xf32>
    %47 = vector.shape_cast %46 : vector<1x1x64xf32> to vector<1x64xf32>
    %48 = vector.broadcast %47 : vector<1x64xf32> to vector<8x64xf32>
    %49 = arith.addf %45, %48 : vector<8x64xf32>
    %50 = arith.negf %49 : vector<8x64xf32>
    %51 = math.exp %50 : vector<8x64xf32>
    %cst_26 = arith.constant 1.000000e+00 : f32
    %52 = vector.broadcast %cst_26 : f32 to vector<8x64xf32>
    %53 = arith.addf %52, %51 : vector<8x64xf32>
    %54 = arith.divf %52, %53 : vector<8x64xf32>
    %55 = arith.mulf %49, %54 : vector<8x64xf32>
    %56 = arith.truncf %55 : vector<8x64xf32> to vector<8x64xbf16>
    %c0_27 = arith.constant 0 : index
    %c0_28 = arith.constant 0 : index
    %c0_29 = arith.constant 0 : index
    %57 = vector.load %arg6[%c0_27, %c0_28, %c0_29] : memref<2x64x96xbf16, #tpu.memory_space<vmem>>, vector<1x64x96xbf16>
    %58 = vector.shape_cast %57 : vector<1x64x96xbf16> to vector<64x96xbf16>
    %cst_30 = arith.constant dense<0.000000e+00> : vector<8x96xf32>
    %59 = tpu.matmul %56, %58, %cst_30 {dimension_numbers = #tpu.dot_dimension_numbers<[1], [0], [0], [1], [0, 0, 1, 1], [], []>} : vector<8x64xbf16>, vector<64x96xbf16>, vector<8x96xf32> -> vector<8x96xf32>
    %60 = vector.extract_strided_slice %59 {offsets = [0, 0], sizes = [8, 16], strides = [1, 1]} : vector<8x96xf32> to vector<8x16xf32>
    %61 = tpu.transpose %60, [1, 0] : vector<8x16xf32> -> vector<16x8xf32>
    %62 = vector.extract_strided_slice %59 {offsets = [0, 16], sizes = [8, 16], strides = [1, 1]} : vector<8x96xf32> to vector<8x16xf32>
    %c0_31 = arith.constant 0 : index
    %c0_32 = arith.constant 0 : index
    %c0_33 = arith.constant 0 : index
    %63 = vector.load %arg7[%c0_31, %c0_32, %c0_33] : memref<2x1x64xf32, #tpu.memory_space<vmem>>, vector<1x1x64xf32>
    %64 = vector.shape_cast %63 : vector<1x1x64xf32> to vector<1x64xf32>
    %65 = vector.extract_strided_slice %59 {offsets = [0, 32], sizes = [8, 64], strides = [1, 1]} : vector<8x96xf32> to vector<8x64xf32>
    %66 = vector.broadcast %64 : vector<1x64xf32> to vector<8x64xf32>
    %67 = arith.addf %66, %65 : vector<8x64xf32>
    %cst_34 = arith.constant 2.000000e+01 : f32
    %68 = vector.broadcast %cst_34 : f32 to vector<8x64xf32>
    %69 = arith.cmpf ogt, %67, %68 : vector<8x64xf32>
    %cst_35 = arith.constant 2.000000e+01 : f32
    %70 = vector.broadcast %cst_35 : f32 to vector<8x64xf32>
    %71 = arith.minimumf %67, %70 : vector<8x64xf32>
    %72 = math.exp %71 : vector<8x64xf32>
    %73 = math.log1p %72 : vector<8x64xf32>
    %74 = arith.select %69, %67, %73 : vector<8x64xi1>, vector<8x64xf32>
    %75 = arith.mulf %74, %55 : vector<8x64xf32>
    %c0_36 = arith.constant 0 : index
    %c0_37 = arith.constant 0 : index
    %c0_38 = arith.constant 0 : index
    %76 = vector.load %arg8[%c0_36, %c0_37, %c0_38] : memref<2x16x64xf32, #tpu.memory_space<vmem>>, vector<1x16x64xf32>
    %77 = vector.shape_cast %76 : vector<1x16x64xf32> to vector<16x64xf32>
    %cst_39 = arith.constant 0.000000e+00 : f32
    %78 = vector.broadcast %cst_39 : f32 to vector<16x64xf32>
    %79 = vector.extract_strided_slice %74 {offsets = [0, 0], sizes = [1, 64], strides = [1, 1]} : vector<8x64xf32> to vector<1x64xf32>
    %80 = vector.extract_strided_slice %75 {offsets = [0, 0], sizes = [1, 64], strides = [1, 1]} : vector<8x64xf32> to vector<1x64xf32>
    %81 = vector.extract_strided_slice %61 {offsets = [0, 0], sizes = [16, 1], strides = [1, 1]} : vector<16x8xf32> to vector<16x1xf32>
    %82 = vector.extract_strided_slice %62 {offsets = [0, 0], sizes = [1, 16], strides = [1, 1]} : vector<8x16xf32> to vector<1x16xf32>
    %83 = vector.broadcast %79 : vector<1x64xf32> to vector<16x64xf32>
    %84 = arith.mulf %83, %77 : vector<16x64xf32>
    %85 = math.exp %84 : vector<16x64xf32>
    %86 = arith.mulf %85, %78 : vector<16x64xf32>
    %87 = vector.broadcast %81 : vector<16x1xf32> to vector<16x64xf32>
    %88 = vector.broadcast %80 : vector<1x64xf32> to vector<16x64xf32>
    %89 = arith.mulf %87, %88 : vector<16x64xf32>
    %90 = arith.addf %86, %89 : vector<16x64xf32>
    %cst_40 = arith.constant dense<0.000000e+00> : vector<1x64xf32>
    %91 = tpu.matmul %82, %90, %cst_40 {dimension_numbers = #tpu.dot_dimension_numbers<[1], [0], [0], [1], [0, 0, 1, 1], [], []>} : vector<1x16xf32>, vector<16x64xf32>, vector<1x64xf32> -> vector<1x64xf32>
    %c0_41 = arith.constant 0 : index
    %c0_42 = arith.constant 0 : index
    %92 = vector.load %arg17[%c0_41, %c0_42] : memref<8x64xf32, #tpu.memory_space<vmem>>, vector<1x64xf32>
    tpu.vector_store %arg17[%c0_41, %c0_42], %91 {strides = array<i32>} : memref<8x64xf32, #tpu.memory_space<vmem>>, vector<1x64xf32>,
    %93 = vector.extract_strided_slice %74 {offsets = [1, 0], sizes = [1, 64], strides = [1, 1]} : vector<8x64xf32> to vector<1x64xf32>
    %94 = vector.extract_strided_slice %75 {offsets = [1, 0], sizes = [1, 64], strides = [1, 1]} : vector<8x64xf32> to vector<1x64xf32>
    %95 = vector.extract_strided_slice %61 {offsets = [0, 1], sizes = [16, 1], strides = [1, 1]} : vector<16x8xf32> to vector<16x1xf32>
    %96 = vector.extract_strided_slice %62 {offsets = [1, 0], sizes = [1, 16], strides = [1, 1]} : vector<8x16xf32> to vector<1x16xf32>
    %97 = vector.broadcast %93 : vector<1x64xf32> to vector<16x64xf32>
    %98 = arith.mulf %97, %77 : vector<16x64xf32>
    %99 = math.exp %98 : vector<16x64xf32>
    %100 = arith.mulf %99, %90 : vector<16x64xf32>
    %101 = vector.broadcast %95 : vector<16x1xf32> to vector<16x64xf32>
    %102 = vector.broadcast %94 : vector<1x64xf32> to vector<16x64xf32>
    %103 = arith.mulf %101, %102 : vector<16x64xf32>
    %104 = arith.addf %100, %103 : vector<16x64xf32>
    %cst_43 = arith.constant dense<0.000000e+00> : vector<1x64xf32>
    %105 = tpu.matmul %96, %104, %cst_43 {dimension_numbers = #tpu.dot_dimension_numbers<[1], [0], [0], [1], [0, 0, 1, 1], [], []>} : vector<1x16xf32>, vector<16x64xf32>, vector<1x64xf32> -> vector<1x64xf32>
    %c1 = arith.constant 1 : index
    %c0_44 = arith.constant 0 : index
    %106 = vector.load %arg17[%c1, %c0_44] : memref<8x64xf32, #tpu.memory_space<vmem>>, vector<1x64xf32>
    tpu.vector_store %arg17[%c1, %c0_44], %105 {strides = array<i32>} : memref<8x64xf32, #tpu.memory_space<vmem>>, vector<1x64xf32>,
    %107 = vector.extract_strided_slice %74 {offsets = [2, 0], sizes = [1, 64], strides = [1, 1]} : vector<8x64xf32> to vector<1x64xf32>
    %108 = vector.extract_strided_slice %75 {offsets = [2, 0], sizes = [1, 64], strides = [1, 1]} : vector<8x64xf32> to vector<1x64xf32>
    %109 = vector.extract_strided_slice %61 {offsets = [0, 2], sizes = [16, 1], strides = [1, 1]} : vector<16x8xf32> to vector<16x1xf32>
    %110 = vector.extract_strided_slice %62 {offsets = [2, 0], sizes = [1, 16], strides = [1, 1]} : vector<8x16xf32> to vector<1x16xf32>
    %111 = vector.broadcast %107 : vector<1x64xf32> to vector<16x64xf32>
    %112 = arith.mulf %111, %77 : vector<16x64xf32>
    %113 = math.exp %112 : vector<16x64xf32>
    %114 = arith.mulf %113, %104 : vector<16x64xf32>
    %115 = vector.broadcast %109 : vector<16x1xf32> to vector<16x64xf32>
    %116 = vector.broadcast %108 : vector<1x64xf32> to vector<16x64xf32>
    %117 = arith.mulf %115, %116 : vector<16x64xf32>
    %118 = arith.addf %114, %117 : vector<16x64xf32>
    %cst_45 = arith.constant dense<0.000000e+00> : vector<1x64xf32>
    %119 = tpu.matmul %110, %118, %cst_45 {dimension_numbers = #tpu.dot_dimension_numbers<[1], [0], [0], [1], [0, 0, 1, 1], [], []>} : vector<1x16xf32>, vector<16x64xf32>, vector<1x64xf32> -> vector<1x64xf32>
    %c2 = arith.constant 2 : index
    %c0_46 = arith.constant 0 : index
    %120 = vector.load %arg17[%c2, %c0_46] : memref<8x64xf32, #tpu.memory_space<vmem>>, vector<1x64xf32>
    tpu.vector_store %arg17[%c2, %c0_46], %119 {strides = array<i32>} : memref<8x64xf32, #tpu.memory_space<vmem>>, vector<1x64xf32>,
    %121 = vector.extract_strided_slice %74 {offsets = [3, 0], sizes = [1, 64], strides = [1, 1]} : vector<8x64xf32> to vector<1x64xf32>
    %122 = vector.extract_strided_slice %75 {offsets = [3, 0], sizes = [1, 64], strides = [1, 1]} : vector<8x64xf32> to vector<1x64xf32>
    %123 = vector.extract_strided_slice %61 {offsets = [0, 3], sizes = [16, 1], strides = [1, 1]} : vector<16x8xf32> to vector<16x1xf32>
    %124 = vector.extract_strided_slice %62 {offsets = [3, 0], sizes = [1, 16], strides = [1, 1]} : vector<8x16xf32> to vector<1x16xf32>
    %125 = vector.broadcast %121 : vector<1x64xf32> to vector<16x64xf32>
    %126 = arith.mulf %125, %77 : vector<16x64xf32>
    %127 = math.exp %126 : vector<16x64xf32>
    %128 = arith.mulf %127, %118 : vector<16x64xf32>
    %129 = vector.broadcast %123 : vector<16x1xf32> to vector<16x64xf32>
    %130 = vector.broadcast %122 : vector<1x64xf32> to vector<16x64xf32>
    %131 = arith.mulf %129, %130 : vector<16x64xf32>
    %132 = arith.addf %128, %131 : vector<16x64xf32>
    %cst_47 = arith.constant dense<0.000000e+00> : vector<1x64xf32>
    %133 = tpu.matmul %124, %132, %cst_47 {dimension_numbers = #tpu.dot_dimension_numbers<[1], [0], [0], [1], [0, 0, 1, 1], [], []>} : vector<1x16xf32>, vector<16x64xf32>, vector<1x64xf32> -> vector<1x64xf32>
    %c3 = arith.constant 3 : index
    %c0_48 = arith.constant 0 : index
    %134 = vector.load %arg17[%c3, %c0_48] : memref<8x64xf32, #tpu.memory_space<vmem>>, vector<1x64xf32>
    tpu.vector_store %arg17[%c3, %c0_48], %133 {strides = array<i32>} : memref<8x64xf32, #tpu.memory_space<vmem>>, vector<1x64xf32>,
    %135 = vector.extract_strided_slice %74 {offsets = [4, 0], sizes = [1, 64], strides = [1, 1]} : vector<8x64xf32> to vector<1x64xf32>
    %136 = vector.extract_strided_slice %75 {offsets = [4, 0], sizes = [1, 64], strides = [1, 1]} : vector<8x64xf32> to vector<1x64xf32>
    %137 = vector.extract_strided_slice %61 {offsets = [0, 4], sizes = [16, 1], strides = [1, 1]} : vector<16x8xf32> to vector<16x1xf32>
    %138 = vector.extract_strided_slice %62 {offsets = [4, 0], sizes = [1, 16], strides = [1, 1]} : vector<8x16xf32> to vector<1x16xf32>
    %139 = vector.broadcast %135 : vector<1x64xf32> to vector<16x64xf32>
    %140 = arith.mulf %139, %77 : vector<16x64xf32>
    %141 = math.exp %140 : vector<16x64xf32>
    %142 = arith.mulf %141, %132 : vector<16x64xf32>
    %143 = vector.broadcast %137 : vector<16x1xf32> to vector<16x64xf32>
    %144 = vector.broadcast %136 : vector<1x64xf32> to vector<16x64xf32>
    %145 = arith.mulf %143, %144 : vector<16x64xf32>
    %146 = arith.addf %142, %145 : vector<16x64xf32>
    %cst_49 = arith.constant dense<0.000000e+00> : vector<1x64xf32>
    %147 = tpu.matmul %138, %146, %cst_49 {dimension_numbers = #tpu.dot_dimension_numbers<[1], [0], [0], [1], [0, 0, 1, 1], [], []>} : vector<1x16xf32>, vector<16x64xf32>, vector<1x64xf32> -> vector<1x64xf32>
    %c4 = arith.constant 4 : index
    %c0_50 = arith.constant 0 : index
    %148 = vector.load %arg17[%c4, %c0_50] : memref<8x64xf32, #tpu.memory_space<vmem>>, vector<1x64xf32>
    tpu.vector_store %arg17[%c4, %c0_50], %147 {strides = array<i32>} : memref<8x64xf32, #tpu.memory_space<vmem>>, vector<1x64xf32>,
    %149 = vector.extract_strided_slice %74 {offsets = [5, 0], sizes = [1, 64], strides = [1, 1]} : vector<8x64xf32> to vector<1x64xf32>
    %150 = vector.extract_strided_slice %75 {offsets = [5, 0], sizes = [1, 64], strides = [1, 1]} : vector<8x64xf32> to vector<1x64xf32>
    %151 = vector.extract_strided_slice %61 {offsets = [0, 5], sizes = [16, 1], strides = [1, 1]} : vector<16x8xf32> to vector<16x1xf32>
    %152 = vector.extract_strided_slice %62 {offsets = [5, 0], sizes = [1, 16], strides = [1, 1]} : vector<8x16xf32> to vector<1x16xf32>
    %153 = vector.broadcast %149 : vector<1x64xf32> to vector<16x64xf32>
    %154 = arith.mulf %153, %77 : vector<16x64xf32>
    %155 = math.exp %154 : vector<16x64xf32>
    %156 = arith.mulf %155, %146 : vector<16x64xf32>
    %157 = vector.broadcast %151 : vector<16x1xf32> to vector<16x64xf32>
    %158 = vector.broadcast %150 : vector<1x64xf32> to vector<16x64xf32>
    %159 = arith.mulf %157, %158 : vector<16x64xf32>
    %160 = arith.addf %156, %159 : vector<16x64xf32>
    %cst_51 = arith.constant dense<0.000000e+00> : vector<1x64xf32>
    %161 = tpu.matmul %152, %160, %cst_51 {dimension_numbers = #tpu.dot_dimension_numbers<[1], [0], [0], [1], [0, 0, 1, 1], [], []>} : vector<1x16xf32>, vector<16x64xf32>, vector<1x64xf32> -> vector<1x64xf32>
    %c5_52 = arith.constant 5 : index
    %c0_53 = arith.constant 0 : index
    %162 = vector.load %arg17[%c5_52, %c0_53] : memref<8x64xf32, #tpu.memory_space<vmem>>, vector<1x64xf32>
    tpu.vector_store %arg17[%c5_52, %c0_53], %161 {strides = array<i32>} : memref<8x64xf32, #tpu.memory_space<vmem>>, vector<1x64xf32>,
    %163 = vector.extract_strided_slice %74 {offsets = [6, 0], sizes = [1, 64], strides = [1, 1]} : vector<8x64xf32> to vector<1x64xf32>
    %164 = vector.extract_strided_slice %75 {offsets = [6, 0], sizes = [1, 64], strides = [1, 1]} : vector<8x64xf32> to vector<1x64xf32>
    %165 = vector.extract_strided_slice %61 {offsets = [0, 6], sizes = [16, 1], strides = [1, 1]} : vector<16x8xf32> to vector<16x1xf32>
    %166 = vector.extract_strided_slice %62 {offsets = [6, 0], sizes = [1, 16], strides = [1, 1]} : vector<8x16xf32> to vector<1x16xf32>
    %167 = vector.broadcast %163 : vector<1x64xf32> to vector<16x64xf32>
    %168 = arith.mulf %167, %77 : vector<16x64xf32>
    %169 = math.exp %168 : vector<16x64xf32>
    %170 = arith.mulf %169, %160 : vector<16x64xf32>
    %171 = vector.broadcast %165 : vector<16x1xf32> to vector<16x64xf32>
    %172 = vector.broadcast %164 : vector<1x64xf32> to vector<16x64xf32>
    %173 = arith.mulf %171, %172 : vector<16x64xf32>
    %174 = arith.addf %170, %173 : vector<16x64xf32>
    %cst_54 = arith.constant dense<0.000000e+00> : vector<1x64xf32>
    %175 = tpu.matmul %166, %174, %cst_54 {dimension_numbers = #tpu.dot_dimension_numbers<[1], [0], [0], [1], [0, 0, 1, 1], [], []>} : vector<1x16xf32>, vector<16x64xf32>, vector<1x64xf32> -> vector<1x64xf32>
    %c6_55 = arith.constant 6 : index
    %c0_56 = arith.constant 0 : index
    %176 = vector.load %arg17[%c6_55, %c0_56] : memref<8x64xf32, #tpu.memory_space<vmem>>, vector<1x64xf32>
    tpu.vector_store %arg17[%c6_55, %c0_56], %175 {strides = array<i32>} : memref<8x64xf32, #tpu.memory_space<vmem>>, vector<1x64xf32>,
    %177 = vector.extract_strided_slice %74 {offsets = [7, 0], sizes = [1, 64], strides = [1, 1]} : vector<8x64xf32> to vector<1x64xf32>
    %178 = vector.extract_strided_slice %75 {offsets = [7, 0], sizes = [1, 64], strides = [1, 1]} : vector<8x64xf32> to vector<1x64xf32>
    %179 = vector.extract_strided_slice %61 {offsets = [0, 7], sizes = [16, 1], strides = [1, 1]} : vector<16x8xf32> to vector<16x1xf32>
    %180 = vector.extract_strided_slice %62 {offsets = [7, 0], sizes = [1, 16], strides = [1, 1]} : vector<8x16xf32> to vector<1x16xf32>
    %181 = vector.broadcast %177 : vector<1x64xf32> to vector<16x64xf32>
    %182 = arith.mulf %181, %77 : vector<16x64xf32>
    %183 = math.exp %182 : vector<16x64xf32>
    %184 = arith.mulf %183, %174 : vector<16x64xf32>
    %185 = vector.broadcast %179 : vector<16x1xf32> to vector<16x64xf32>
    %186 = vector.broadcast %178 : vector<1x64xf32> to vector<16x64xf32>
    %187 = arith.mulf %185, %186 : vector<16x64xf32>
    %188 = arith.addf %184, %187 : vector<16x64xf32>
    %cst_57 = arith.constant dense<0.000000e+00> : vector<1x64xf32>
    %189 = tpu.matmul %180, %188, %cst_57 {dimension_numbers = #tpu.dot_dimension_numbers<[1], [0], [0], [1], [0, 0, 1, 1], [], []>} : vector<1x16xf32>, vector<16x64xf32>, vector<1x64xf32> -> vector<1x64xf32>
    %c7_58 = arith.constant 7 : index
    %c0_59 = arith.constant 0 : index
    %190 = vector.load %arg17[%c7_58, %c0_59] : memref<8x64xf32, #tpu.memory_space<vmem>>, vector<1x64xf32>
    tpu.vector_store %arg17[%c7_58, %c0_59], %189 {strides = array<i32>} : memref<8x64xf32, #tpu.memory_space<vmem>>, vector<1x64xf32>,
    %c0_60 = arith.constant 0 : index
    %c0_61 = arith.constant 0 : index
    %191 = vector.load %arg17[%c0_60, %c0_61] : memref<8x64xf32, #tpu.memory_space<vmem>>, vector<8x64xf32>
    %c0_62 = arith.constant 0 : index
    %c0_63 = arith.constant 0 : index
    %c0_64 = arith.constant 0 : index
    %192 = vector.load %arg9[%c0_62, %c0_63, %c0_64] : memref<2x1x64xf32, #tpu.memory_space<vmem>>, vector<1x1x64xf32>
    %193 = vector.shape_cast %192 : vector<1x1x64xf32> to vector<1x64xf32>
    %194 = vector.broadcast %193 : vector<1x64xf32> to vector<8x64xf32>
    %195 = arith.mulf %194, %55 : vector<8x64xf32>
    %196 = arith.addf %191, %195 : vector<8x64xf32>
    %197 = arith.negf %23 : vector<8x64xf32>
    %198 = math.exp %197 : vector<8x64xf32>
    %cst_65 = arith.constant 1.000000e+00 : f32
    %199 = vector.broadcast %cst_65 : f32 to vector<8x64xf32>
    %200 = arith.addf %199, %198 : vector<8x64xf32>
    %201 = arith.divf %199, %200 : vector<8x64xf32>
    %202 = arith.mulf %23, %201 : vector<8x64xf32>
    %203 = arith.mulf %196, %202 : vector<8x64xf32>
    %204 = arith.truncf %203 : vector<8x64xf32> to vector<8x64xbf16>
    %c0_66 = arith.constant 0 : index
    %c0_67 = arith.constant 0 : index
    %c0_68 = arith.constant 0 : index
    %205 = vector.load %arg10[%c0_66, %c0_67, %c0_68] : memref<2x64x32xbf16, #tpu.memory_space<vmem>>, vector<1x64x32xbf16>
    %206 = vector.shape_cast %205 : vector<1x64x32xbf16> to vector<64x32xbf16>
    %cst_69 = arith.constant dense<0.000000e+00> : vector<8x32xf32>
    %207 = tpu.matmul %204, %206, %cst_69 {dimension_numbers = #tpu.dot_dimension_numbers<[1], [0], [0], [1], [0, 0, 1, 1], [], []>} : vector<8x64xbf16>, vector<64x32xbf16>, vector<8x32xf32> -> vector<8x32xf32>
    %208 = arith.addf %207, %1 : vector<8x32xf32>
    %209 = arith.mulf %208, %208 : vector<8x32xf32>
    %cst_70 = arith.constant dense<0.000000e+00> : vector<8xf32>
    %210 = vector.multi_reduction <add>, %209, %cst_70 [1] : vector<8x32xf32> to vector<8xf32>
    %211 = vector.shape_cast %210 : vector<8xf32> to vector<8x1xf32>
    %cst_71 = arith.constant 3.200000e+01 : f32
    %212 = vector.broadcast %cst_71 : f32 to vector<8x1xf32>
    %213 = arith.divf %211, %212 : vector<8x1xf32>
    %cst_72 = arith.constant 9.99999997E-7 : f32
    %214 = vector.broadcast %cst_72 : f32 to vector<8x1xf32>
    %215 = arith.addf %213, %214 : vector<8x1xf32>
    %216 = math.rsqrt %215 : vector<8x1xf32>
    %217 = vector.broadcast %216 : vector<8x1xf32> to vector<8x32xf32>
    %218 = arith.mulf %208, %217 : vector<8x32xf32>
    %c1_73 = arith.constant 1 : index
    %c0_74 = arith.constant 0 : index
    %c0_75 = arith.constant 0 : index
    %219 = vector.load %arg2[%c1_73, %c0_74, %c0_75] : memref<2x1x32xf32, #tpu.memory_space<vmem>>, vector<1x1x32xf32>
    %220 = vector.shape_cast %219 : vector<1x1x32xf32> to vector<1x32xf32>
    %221 = vector.broadcast %220 : vector<1x32xf32> to vector<8x32xf32>
    %222 = arith.mulf %218, %221 : vector<8x32xf32>
    %223 = arith.truncf %222 : vector<8x32xf32> to vector<8x32xbf16>
    %c1_76 = arith.constant 1 : index
    %c0_77 = arith.constant 0 : index
    %c0_78 = arith.constant 0 : index
    %224 = vector.load %arg3[%c1_76, %c0_77, %c0_78] : memref<2x32x128xbf16, #tpu.memory_space<vmem>>, vector<1x32x128xbf16>
    %225 = vector.shape_cast %224 : vector<1x32x128xbf16> to vector<32x128xbf16>
    %cst_79 = arith.constant dense<0.000000e+00> : vector<8x128xf32>
    %226 = tpu.matmul %223, %225, %cst_79 {dimension_numbers = #tpu.dot_dimension_numbers<[1], [0], [0], [1], [0, 0, 1, 1], [], []>} : vector<8x32xbf16>, vector<32x128xbf16>, vector<8x128xf32> -> vector<8x128xf32>
    %227 = vector.extract_strided_slice %226 {offsets = [0, 0], sizes = [8, 64], strides = [1, 1]} : vector<8x128xf32> to vector<8x64xf32>
    %228 = vector.extract_strided_slice %226 {offsets = [0, 64], sizes = [8, 64], strides = [1, 1]} : vector<8x128xf32> to vector<8x64xf32>
    %c8_80 = arith.constant 8 : index
    %c0_81 = arith.constant 0 : index
    %229 = vector.load %arg16[%c8_80, %c0_81] : memref<16x64xf32, #tpu.memory_space<vmem>>, vector<8x64xf32>
    tpu.vector_store %arg16[%c8_80, %c0_81], %227 {strides = array<i32>} : memref<16x64xf32, #tpu.memory_space<vmem>>, vector<8x64xf32>,
    %c1_82 = arith.constant 1 : index
    %c0_83 = arith.constant 0 : index
    %c0_84 = arith.constant 0 : index
    %230 = vector.load %arg4[%c1_82, %c0_83, %c0_84] : memref<2x4x64xf32, #tpu.memory_space<vmem>>, vector<1x4x64xf32>
    %231 = vector.shape_cast %230 : vector<1x4x64xf32> to vector<4x64xf32>
    %c5_85 = arith.constant 5 : index
    %c0_86 = arith.constant 0 : index
    %232 = vector.load %arg16[%c5_85, %c0_86] : memref<16x64xf32, #tpu.memory_space<vmem>>, vector<8x64xf32>
    %233 = vector.extract_strided_slice %231 {offsets = [0, 0], sizes = [1, 64], strides = [1, 1]} : vector<4x64xf32> to vector<1x64xf32>
    %234 = vector.broadcast %233 : vector<1x64xf32> to vector<8x64xf32>
    %235 = arith.mulf %232, %234 : vector<8x64xf32>
    %c6_87 = arith.constant 6 : index
    %c0_88 = arith.constant 0 : index
    %236 = vector.load %arg16[%c6_87, %c0_88] : memref<16x64xf32, #tpu.memory_space<vmem>>, vector<8x64xf32>
    %237 = vector.extract_strided_slice %231 {offsets = [1, 0], sizes = [1, 64], strides = [1, 1]} : vector<4x64xf32> to vector<1x64xf32>
    %238 = vector.broadcast %237 : vector<1x64xf32> to vector<8x64xf32>
    %239 = arith.mulf %236, %238 : vector<8x64xf32>
    %240 = arith.addf %235, %239 : vector<8x64xf32>
    %c7_89 = arith.constant 7 : index
    %c0_90 = arith.constant 0 : index
    %241 = vector.load %arg16[%c7_89, %c0_90] : memref<16x64xf32, #tpu.memory_space<vmem>>, vector<8x64xf32>
    %242 = vector.extract_strided_slice %231 {offsets = [2, 0], sizes = [1, 64], strides = [1, 1]} : vector<4x64xf32> to vector<1x64xf32>
    %243 = vector.broadcast %242 : vector<1x64xf32> to vector<8x64xf32>
    %244 = arith.mulf %241, %243 : vector<8x64xf32>
    %245 = arith.addf %240, %244 : vector<8x64xf32>
    %c8_91 = arith.constant 8 : index
    %c0_92 = arith.constant 0 : index
    %246 = vector.load %arg16[%c8_91, %c0_92] : memref<16x64xf32, #tpu.memory_space<vmem>>, vector<8x64xf32>
    %247 = vector.extract_strided_slice %231 {offsets = [3, 0], sizes = [1, 64], strides = [1, 1]} : vector<4x64xf32> to vector<1x64xf32>
    %248 = vector.broadcast %247 : vector<1x64xf32> to vector<8x64xf32>
    %249 = arith.mulf %246, %248 : vector<8x64xf32>
    %250 = arith.addf %245, %249 : vector<8x64xf32>
    %c1_93 = arith.constant 1 : index
    %c0_94 = arith.constant 0 : index
    %c0_95 = arith.constant 0 : index
    %251 = vector.load %arg5[%c1_93, %c0_94, %c0_95] : memref<2x1x64xf32, #tpu.memory_space<vmem>>, vector<1x1x64xf32>
    %252 = vector.shape_cast %251 : vector<1x1x64xf32> to vector<1x64xf32>
    %253 = vector.broadcast %252 : vector<1x64xf32> to vector<8x64xf32>
    %254 = arith.addf %250, %253 : vector<8x64xf32>
    %255 = arith.negf %254 : vector<8x64xf32>
    %256 = math.exp %255 : vector<8x64xf32>
    %cst_96 = arith.constant 1.000000e+00 : f32
    %257 = vector.broadcast %cst_96 : f32 to vector<8x64xf32>
    %258 = arith.addf %257, %256 : vector<8x64xf32>
    %259 = arith.divf %257, %258 : vector<8x64xf32>
    %260 = arith.mulf %254, %259 : vector<8x64xf32>
    %261 = arith.truncf %260 : vector<8x64xf32> to vector<8x64xbf16>
    %c1_97 = arith.constant 1 : index
    %c0_98 = arith.constant 0 : index
    %c0_99 = arith.constant 0 : index
    %262 = vector.load %arg6[%c1_97, %c0_98, %c0_99] : memref<2x64x96xbf16, #tpu.memory_space<vmem>>, vector<1x64x96xbf16>
    %263 = vector.shape_cast %262 : vector<1x64x96xbf16> to vector<64x96xbf16>
    %cst_100 = arith.constant dense<0.000000e+00> : vector<8x96xf32>
    %264 = tpu.matmul %261, %263, %cst_100 {dimension_numbers = #tpu.dot_dimension_numbers<[1], [0], [0], [1], [0, 0, 1, 1], [], []>} : vector<8x64xbf16>, vector<64x96xbf16>, vector<8x96xf32> -> vector<8x96xf32>
    %265 = vector.extract_strided_slice %264 {offsets = [0, 0], sizes = [8, 16], strides = [1, 1]} : vector<8x96xf32> to vector<8x16xf32>
    %266 = tpu.transpose %265, [1, 0] : vector<8x16xf32> -> vector<16x8xf32>
    %267 = vector.extract_strided_slice %264 {offsets = [0, 16], sizes = [8, 16], strides = [1, 1]} : vector<8x96xf32> to vector<8x16xf32>
    %c1_101 = arith.constant 1 : index
    %c0_102 = arith.constant 0 : index
    %c0_103 = arith.constant 0 : index
    %268 = vector.load %arg7[%c1_101, %c0_102, %c0_103] : memref<2x1x64xf32, #tpu.memory_space<vmem>>, vector<1x1x64xf32>
    %269 = vector.shape_cast %268 : vector<1x1x64xf32> to vector<1x64xf32>
    %270 = vector.extract_strided_slice %264 {offsets = [0, 32], sizes = [8, 64], strides = [1, 1]} : vector<8x96xf32> to vector<8x64xf32>
    %271 = vector.broadcast %269 : vector<1x64xf32> to vector<8x64xf32>
    %272 = arith.addf %271, %270 : vector<8x64xf32>
    %cst_104 = arith.constant 2.000000e+01 : f32
    %273 = vector.broadcast %cst_104 : f32 to vector<8x64xf32>
    %274 = arith.cmpf ogt, %272, %273 : vector<8x64xf32>
    %cst_105 = arith.constant 2.000000e+01 : f32
    %275 = vector.broadcast %cst_105 : f32 to vector<8x64xf32>
    %276 = arith.minimumf %272, %275 : vector<8x64xf32>
    %277 = math.exp %276 : vector<8x64xf32>
    %278 = math.log1p %277 : vector<8x64xf32>
    %279 = arith.select %274, %272, %278 : vector<8x64xi1>, vector<8x64xf32>
    %280 = arith.mulf %279, %260 : vector<8x64xf32>
    %c1_106 = arith.constant 1 : index
    %c0_107 = arith.constant 0 : index
    %c0_108 = arith.constant 0 : index
    %281 = vector.load %arg8[%c1_106, %c0_107, %c0_108] : memref<2x16x64xf32, #tpu.memory_space<vmem>>, vector<1x16x64xf32>
    %282 = vector.shape_cast %281 : vector<1x16x64xf32> to vector<16x64xf32>
    %cst_109 = arith.constant 0.000000e+00 : f32
    %283 = vector.broadcast %cst_109 : f32 to vector<16x64xf32>
    %284 = vector.extract_strided_slice %279 {offsets = [0, 0], sizes = [1, 64], strides = [1, 1]} : vector<8x64xf32> to vector<1x64xf32>
    %285 = vector.extract_strided_slice %280 {offsets = [0, 0], sizes = [1, 64], strides = [1, 1]} : vector<8x64xf32> to vector<1x64xf32>
    %286 = vector.extract_strided_slice %266 {offsets = [0, 0], sizes = [16, 1], strides = [1, 1]} : vector<16x8xf32> to vector<16x1xf32>
    %287 = vector.extract_strided_slice %267 {offsets = [0, 0], sizes = [1, 16], strides = [1, 1]} : vector<8x16xf32> to vector<1x16xf32>
    %288 = vector.broadcast %284 : vector<1x64xf32> to vector<16x64xf32>
    %289 = arith.mulf %288, %282 : vector<16x64xf32>
    %290 = math.exp %289 : vector<16x64xf32>
    %291 = arith.mulf %290, %283 : vector<16x64xf32>
    %292 = vector.broadcast %286 : vector<16x1xf32> to vector<16x64xf32>
    %293 = vector.broadcast %285 : vector<1x64xf32> to vector<16x64xf32>
    %294 = arith.mulf %292, %293 : vector<16x64xf32>
    %295 = arith.addf %291, %294 : vector<16x64xf32>
    %cst_110 = arith.constant dense<0.000000e+00> : vector<1x64xf32>
    %296 = tpu.matmul %287, %295, %cst_110 {dimension_numbers = #tpu.dot_dimension_numbers<[1], [0], [0], [1], [0, 0, 1, 1], [], []>} : vector<1x16xf32>, vector<16x64xf32>, vector<1x64xf32> -> vector<1x64xf32>
    %c0_111 = arith.constant 0 : index
    %c0_112 = arith.constant 0 : index
    %297 = vector.load %arg17[%c0_111, %c0_112] : memref<8x64xf32, #tpu.memory_space<vmem>>, vector<1x64xf32>
    tpu.vector_store %arg17[%c0_111, %c0_112], %296 {strides = array<i32>} : memref<8x64xf32, #tpu.memory_space<vmem>>, vector<1x64xf32>,
    %298 = vector.extract_strided_slice %279 {offsets = [1, 0], sizes = [1, 64], strides = [1, 1]} : vector<8x64xf32> to vector<1x64xf32>
    %299 = vector.extract_strided_slice %280 {offsets = [1, 0], sizes = [1, 64], strides = [1, 1]} : vector<8x64xf32> to vector<1x64xf32>
    %300 = vector.extract_strided_slice %266 {offsets = [0, 1], sizes = [16, 1], strides = [1, 1]} : vector<16x8xf32> to vector<16x1xf32>
    %301 = vector.extract_strided_slice %267 {offsets = [1, 0], sizes = [1, 16], strides = [1, 1]} : vector<8x16xf32> to vector<1x16xf32>
    %302 = vector.broadcast %298 : vector<1x64xf32> to vector<16x64xf32>
    %303 = arith.mulf %302, %282 : vector<16x64xf32>
    %304 = math.exp %303 : vector<16x64xf32>
    %305 = arith.mulf %304, %295 : vector<16x64xf32>
    %306 = vector.broadcast %300 : vector<16x1xf32> to vector<16x64xf32>
    %307 = vector.broadcast %299 : vector<1x64xf32> to vector<16x64xf32>
    %308 = arith.mulf %306, %307 : vector<16x64xf32>
    %309 = arith.addf %305, %308 : vector<16x64xf32>
    %cst_113 = arith.constant dense<0.000000e+00> : vector<1x64xf32>
    %310 = tpu.matmul %301, %309, %cst_113 {dimension_numbers = #tpu.dot_dimension_numbers<[1], [0], [0], [1], [0, 0, 1, 1], [], []>} : vector<1x16xf32>, vector<16x64xf32>, vector<1x64xf32> -> vector<1x64xf32>
    %c1_114 = arith.constant 1 : index
    %c0_115 = arith.constant 0 : index
    %311 = vector.load %arg17[%c1_114, %c0_115] : memref<8x64xf32, #tpu.memory_space<vmem>>, vector<1x64xf32>
    tpu.vector_store %arg17[%c1_114, %c0_115], %310 {strides = array<i32>} : memref<8x64xf32, #tpu.memory_space<vmem>>, vector<1x64xf32>,
    %312 = vector.extract_strided_slice %279 {offsets = [2, 0], sizes = [1, 64], strides = [1, 1]} : vector<8x64xf32> to vector<1x64xf32>
    %313 = vector.extract_strided_slice %280 {offsets = [2, 0], sizes = [1, 64], strides = [1, 1]} : vector<8x64xf32> to vector<1x64xf32>
    %314 = vector.extract_strided_slice %266 {offsets = [0, 2], sizes = [16, 1], strides = [1, 1]} : vector<16x8xf32> to vector<16x1xf32>
    %315 = vector.extract_strided_slice %267 {offsets = [2, 0], sizes = [1, 16], strides = [1, 1]} : vector<8x16xf32> to vector<1x16xf32>
    %316 = vector.broadcast %312 : vector<1x64xf32> to vector<16x64xf32>
    %317 = arith.mulf %316, %282 : vector<16x64xf32>
    %318 = math.exp %317 : vector<16x64xf32>
    %319 = arith.mulf %318, %309 : vector<16x64xf32>
    %320 = vector.broadcast %314 : vector<16x1xf32> to vector<16x64xf32>
    %321 = vector.broadcast %313 : vector<1x64xf32> to vector<16x64xf32>
    %322 = arith.mulf %320, %321 : vector<16x64xf32>
    %323 = arith.addf %319, %322 : vector<16x64xf32>
    %cst_116 = arith.constant dense<0.000000e+00> : vector<1x64xf32>
    %324 = tpu.matmul %315, %323, %cst_116 {dimension_numbers = #tpu.dot_dimension_numbers<[1], [0], [0], [1], [0, 0, 1, 1], [], []>} : vector<1x16xf32>, vector<16x64xf32>, vector<1x64xf32> -> vector<1x64xf32>
    %c2_117 = arith.constant 2 : index
    %c0_118 = arith.constant 0 : index
    %325 = vector.load %arg17[%c2_117, %c0_118] : memref<8x64xf32, #tpu.memory_space<vmem>>, vector<1x64xf32>
    tpu.vector_store %arg17[%c2_117, %c0_118], %324 {strides = array<i32>} : memref<8x64xf32, #tpu.memory_space<vmem>>, vector<1x64xf32>,
    %326 = vector.extract_strided_slice %279 {offsets = [3, 0], sizes = [1, 64], strides = [1, 1]} : vector<8x64xf32> to vector<1x64xf32>
    %327 = vector.extract_strided_slice %280 {offsets = [3, 0], sizes = [1, 64], strides = [1, 1]} : vector<8x64xf32> to vector<1x64xf32>
    %328 = vector.extract_strided_slice %266 {offsets = [0, 3], sizes = [16, 1], strides = [1, 1]} : vector<16x8xf32> to vector<16x1xf32>
    %329 = vector.extract_strided_slice %267 {offsets = [3, 0], sizes = [1, 16], strides = [1, 1]} : vector<8x16xf32> to vector<1x16xf32>
    %330 = vector.broadcast %326 : vector<1x64xf32> to vector<16x64xf32>
    %331 = arith.mulf %330, %282 : vector<16x64xf32>
    %332 = math.exp %331 : vector<16x64xf32>
    %333 = arith.mulf %332, %323 : vector<16x64xf32>
    %334 = vector.broadcast %328 : vector<16x1xf32> to vector<16x64xf32>
    %335 = vector.broadcast %327 : vector<1x64xf32> to vector<16x64xf32>
    %336 = arith.mulf %334, %335 : vector<16x64xf32>
    %337 = arith.addf %333, %336 : vector<16x64xf32>
    %cst_119 = arith.constant dense<0.000000e+00> : vector<1x64xf32>
    %338 = tpu.matmul %329, %337, %cst_119 {dimension_numbers = #tpu.dot_dimension_numbers<[1], [0], [0], [1], [0, 0, 1, 1], [], []>} : vector<1x16xf32>, vector<16x64xf32>, vector<1x64xf32> -> vector<1x64xf32>
    %c3_120 = arith.constant 3 : index
    %c0_121 = arith.constant 0 : index
    %339 = vector.load %arg17[%c3_120, %c0_121] : memref<8x64xf32, #tpu.memory_space<vmem>>, vector<1x64xf32>
    tpu.vector_store %arg17[%c3_120, %c0_121], %338 {strides = array<i32>} : memref<8x64xf32, #tpu.memory_space<vmem>>, vector<1x64xf32>,
    %340 = vector.extract_strided_slice %279 {offsets = [4, 0], sizes = [1, 64], strides = [1, 1]} : vector<8x64xf32> to vector<1x64xf32>
    %341 = vector.extract_strided_slice %280 {offsets = [4, 0], sizes = [1, 64], strides = [1, 1]} : vector<8x64xf32> to vector<1x64xf32>
    %342 = vector.extract_strided_slice %266 {offsets = [0, 4], sizes = [16, 1], strides = [1, 1]} : vector<16x8xf32> to vector<16x1xf32>
    %343 = vector.extract_strided_slice %267 {offsets = [4, 0], sizes = [1, 16], strides = [1, 1]} : vector<8x16xf32> to vector<1x16xf32>
    %344 = vector.broadcast %340 : vector<1x64xf32> to vector<16x64xf32>
    %345 = arith.mulf %344, %282 : vector<16x64xf32>
    %346 = math.exp %345 : vector<16x64xf32>
    %347 = arith.mulf %346, %337 : vector<16x64xf32>
    %348 = vector.broadcast %342 : vector<16x1xf32> to vector<16x64xf32>
    %349 = vector.broadcast %341 : vector<1x64xf32> to vector<16x64xf32>
    %350 = arith.mulf %348, %349 : vector<16x64xf32>
    %351 = arith.addf %347, %350 : vector<16x64xf32>
    %cst_122 = arith.constant dense<0.000000e+00> : vector<1x64xf32>
    %352 = tpu.matmul %343, %351, %cst_122 {dimension_numbers = #tpu.dot_dimension_numbers<[1], [0], [0], [1], [0, 0, 1, 1], [], []>} : vector<1x16xf32>, vector<16x64xf32>, vector<1x64xf32> -> vector<1x64xf32>
    %c4_123 = arith.constant 4 : index
    %c0_124 = arith.constant 0 : index
    %353 = vector.load %arg17[%c4_123, %c0_124] : memref<8x64xf32, #tpu.memory_space<vmem>>, vector<1x64xf32>
    tpu.vector_store %arg17[%c4_123, %c0_124], %352 {strides = array<i32>} : memref<8x64xf32, #tpu.memory_space<vmem>>, vector<1x64xf32>,
    %354 = vector.extract_strided_slice %279 {offsets = [5, 0], sizes = [1, 64], strides = [1, 1]} : vector<8x64xf32> to vector<1x64xf32>
    %355 = vector.extract_strided_slice %280 {offsets = [5, 0], sizes = [1, 64], strides = [1, 1]} : vector<8x64xf32> to vector<1x64xf32>
    %356 = vector.extract_strided_slice %266 {offsets = [0, 5], sizes = [16, 1], strides = [1, 1]} : vector<16x8xf32> to vector<16x1xf32>
    %357 = vector.extract_strided_slice %267 {offsets = [5, 0], sizes = [1, 16], strides = [1, 1]} : vector<8x16xf32> to vector<1x16xf32>
    %358 = vector.broadcast %354 : vector<1x64xf32> to vector<16x64xf32>
    %359 = arith.mulf %358, %282 : vector<16x64xf32>
    %360 = math.exp %359 : vector<16x64xf32>
    %361 = arith.mulf %360, %351 : vector<16x64xf32>
    %362 = vector.broadcast %356 : vector<16x1xf32> to vector<16x64xf32>
    %363 = vector.broadcast %355 : vector<1x64xf32> to vector<16x64xf32>
    %364 = arith.mulf %362, %363 : vector<16x64xf32>
    %365 = arith.addf %361, %364 : vector<16x64xf32>
    %cst_125 = arith.constant dense<0.000000e+00> : vector<1x64xf32>
    %366 = tpu.matmul %357, %365, %cst_125 {dimension_numbers = #tpu.dot_dimension_numbers<[1], [0], [0], [1], [0, 0, 1, 1], [], []>} : vector<1x16xf32>, vector<16x64xf32>, vector<1x64xf32> -> vector<1x64xf32>
    %c5_126 = arith.constant 5 : index
    %c0_127 = arith.constant 0 : index
    %367 = vector.load %arg17[%c5_126, %c0_127] : memref<8x64xf32, #tpu.memory_space<vmem>>, vector<1x64xf32>
    tpu.vector_store %arg17[%c5_126, %c0_127], %366 {strides = array<i32>} : memref<8x64xf32, #tpu.memory_space<vmem>>, vector<1x64xf32>,
    %368 = vector.extract_strided_slice %279 {offsets = [6, 0], sizes = [1, 64], strides = [1, 1]} : vector<8x64xf32> to vector<1x64xf32>
    %369 = vector.extract_strided_slice %280 {offsets = [6, 0], sizes = [1, 64], strides = [1, 1]} : vector<8x64xf32> to vector<1x64xf32>
    %370 = vector.extract_strided_slice %266 {offsets = [0, 6], sizes = [16, 1], strides = [1, 1]} : vector<16x8xf32> to vector<16x1xf32>
    %371 = vector.extract_strided_slice %267 {offsets = [6, 0], sizes = [1, 16], strides = [1, 1]} : vector<8x16xf32> to vector<1x16xf32>
    %372 = vector.broadcast %368 : vector<1x64xf32> to vector<16x64xf32>
    %373 = arith.mulf %372, %282 : vector<16x64xf32>
    %374 = math.exp %373 : vector<16x64xf32>
    %375 = arith.mulf %374, %365 : vector<16x64xf32>
    %376 = vector.broadcast %370 : vector<16x1xf32> to vector<16x64xf32>
    %377 = vector.broadcast %369 : vector<1x64xf32> to vector<16x64xf32>
    %378 = arith.mulf %376, %377 : vector<16x64xf32>
    %379 = arith.addf %375, %378 : vector<16x64xf32>
    %cst_128 = arith.constant dense<0.000000e+00> : vector<1x64xf32>
    %380 = tpu.matmul %371, %379, %cst_128 {dimension_numbers = #tpu.dot_dimension_numbers<[1], [0], [0], [1], [0, 0, 1, 1], [], []>} : vector<1x16xf32>, vector<16x64xf32>, vector<1x64xf32> -> vector<1x64xf32>
    %c6_129 = arith.constant 6 : index
    %c0_130 = arith.constant 0 : index
    %381 = vector.load %arg17[%c6_129, %c0_130] : memref<8x64xf32, #tpu.memory_space<vmem>>, vector<1x64xf32>
    tpu.vector_store %arg17[%c6_129, %c0_130], %380 {strides = array<i32>} : memref<8x64xf32, #tpu.memory_space<vmem>>, vector<1x64xf32>,
    %382 = vector.extract_strided_slice %279 {offsets = [7, 0], sizes = [1, 64], strides = [1, 1]} : vector<8x64xf32> to vector<1x64xf32>
    %383 = vector.extract_strided_slice %280 {offsets = [7, 0], sizes = [1, 64], strides = [1, 1]} : vector<8x64xf32> to vector<1x64xf32>
    %384 = vector.extract_strided_slice %266 {offsets = [0, 7], sizes = [16, 1], strides = [1, 1]} : vector<16x8xf32> to vector<16x1xf32>
    %385 = vector.extract_strided_slice %267 {offsets = [7, 0], sizes = [1, 16], strides = [1, 1]} : vector<8x16xf32> to vector<1x16xf32>
    %386 = vector.broadcast %382 : vector<1x64xf32> to vector<16x64xf32>
    %387 = arith.mulf %386, %282 : vector<16x64xf32>
    %388 = math.exp %387 : vector<16x64xf32>
    %389 = arith.mulf %388, %379 : vector<16x64xf32>
    %390 = vector.broadcast %384 : vector<16x1xf32> to vector<16x64xf32>
    %391 = vector.broadcast %383 : vector<1x64xf32> to vector<16x64xf32>
    %392 = arith.mulf %390, %391 : vector<16x64xf32>
    %393 = arith.addf %389, %392 : vector<16x64xf32>
    %cst_131 = arith.constant dense<0.000000e+00> : vector<1x64xf32>
    %394 = tpu.matmul %385, %393, %cst_131 {dimension_numbers = #tpu.dot_dimension_numbers<[1], [0], [0], [1], [0, 0, 1, 1], [], []>} : vector<1x16xf32>, vector<16x64xf32>, vector<1x64xf32> -> vector<1x64xf32>
    %c7_132 = arith.constant 7 : index
    %c0_133 = arith.constant 0 : index
    %395 = vector.load %arg17[%c7_132, %c0_133] : memref<8x64xf32, #tpu.memory_space<vmem>>, vector<1x64xf32>
    tpu.vector_store %arg17[%c7_132, %c0_133], %394 {strides = array<i32>} : memref<8x64xf32, #tpu.memory_space<vmem>>, vector<1x64xf32>,
    %c0_134 = arith.constant 0 : index
    %c0_135 = arith.constant 0 : index
    %396 = vector.load %arg17[%c0_134, %c0_135] : memref<8x64xf32, #tpu.memory_space<vmem>>, vector<8x64xf32>
    %c1_136 = arith.constant 1 : index
    %c0_137 = arith.constant 0 : index
    %c0_138 = arith.constant 0 : index
    %397 = vector.load %arg9[%c1_136, %c0_137, %c0_138] : memref<2x1x64xf32, #tpu.memory_space<vmem>>, vector<1x1x64xf32>
    %398 = vector.shape_cast %397 : vector<1x1x64xf32> to vector<1x64xf32>
    %399 = vector.broadcast %398 : vector<1x64xf32> to vector<8x64xf32>
    %400 = arith.mulf %399, %260 : vector<8x64xf32>
    %401 = arith.addf %396, %400 : vector<8x64xf32>
    %402 = arith.negf %228 : vector<8x64xf32>
    %403 = math.exp %402 : vector<8x64xf32>
    %cst_139 = arith.constant 1.000000e+00 : f32
    %404 = vector.broadcast %cst_139 : f32 to vector<8x64xf32>
    %405 = arith.addf %404, %403 : vector<8x64xf32>
    %406 = arith.divf %404, %405 : vector<8x64xf32>
    %407 = arith.mulf %228, %406 : vector<8x64xf32>
    %408 = arith.mulf %401, %407 : vector<8x64xf32>
    %409 = arith.truncf %408 : vector<8x64xf32> to vector<8x64xbf16>
    %c1_140 = arith.constant 1 : index
    %c0_141 = arith.constant 0 : index
    %c0_142 = arith.constant 0 : index
    %410 = vector.load %arg10[%c1_140, %c0_141, %c0_142] : memref<2x64x32xbf16, #tpu.memory_space<vmem>>, vector<1x64x32xbf16>
    %411 = vector.shape_cast %410 : vector<1x64x32xbf16> to vector<64x32xbf16>
    %cst_143 = arith.constant dense<0.000000e+00> : vector<8x32xf32>
    %412 = tpu.matmul %409, %411, %cst_143 {dimension_numbers = #tpu.dot_dimension_numbers<[1], [0], [0], [1], [0, 0, 1, 1], [], []>} : vector<8x64xbf16>, vector<64x32xbf16>, vector<8x32xf32> -> vector<8x32xf32>
    %413 = arith.addf %412, %208 : vector<8x32xf32>
    %cst_144 = arith.constant dense<0.000000e+00> : vector<8xf32>
    %414 = vector.multi_reduction <add>, %413, %cst_144 [1] : vector<8x32xf32> to vector<8xf32>
    %415 = vector.shape_cast %414 : vector<8xf32> to vector<8x1xf32>
    %cst_145 = arith.constant 3.200000e+01 : f32
    %416 = vector.broadcast %cst_145 : f32 to vector<8x1xf32>
    %417 = arith.divf %415, %416 : vector<8x1xf32>
    %418 = vector.broadcast %417 : vector<8x1xf32> to vector<8x32xf32>
    %419 = arith.subf %413, %418 : vector<8x32xf32>
    %420 = arith.mulf %419, %419 : vector<8x32xf32>
    %cst_146 = arith.constant dense<0.000000e+00> : vector<8xf32>
    %421 = vector.multi_reduction <add>, %420, %cst_146 [1] : vector<8x32xf32> to vector<8xf32>
    %422 = vector.shape_cast %421 : vector<8xf32> to vector<8x1xf32>
    %cst_147 = arith.constant 3.200000e+01 : f32
    %423 = vector.broadcast %cst_147 : f32 to vector<8x1xf32>
    %424 = arith.divf %422, %423 : vector<8x1xf32>
    %425 = vector.broadcast %417 : vector<8x1xf32> to vector<8x32xf32>
    %426 = arith.subf %413, %425 : vector<8x32xf32>
    %cst_148 = arith.constant 9.99999974E-6 : f32
    %427 = vector.broadcast %cst_148 : f32 to vector<8x1xf32>
    %428 = arith.addf %424, %427 : vector<8x1xf32>
    %429 = math.rsqrt %428 : vector<8x1xf32>
    %430 = vector.broadcast %429 : vector<8x1xf32> to vector<8x32xf32>
    %431 = arith.mulf %426, %430 : vector<8x32xf32>
    %c0_149 = arith.constant 0 : index
    %c0_150 = arith.constant 0 : index
    %432 = vector.load %arg11[%c0_149, %c0_150] : memref<1x32xf32, #tpu.memory_space<vmem>>, vector<1x32xf32>
    %433 = vector.broadcast %432 : vector<1x32xf32> to vector<8x32xf32>
    %434 = arith.mulf %431, %433 : vector<8x32xf32>
    %c0_151 = arith.constant 0 : index
    %c0_152 = arith.constant 0 : index
    %435 = vector.load %arg12[%c0_151, %c0_152] : memref<1x32xf32, #tpu.memory_space<vmem>>, vector<1x32xf32>
    %436 = vector.broadcast %435 : vector<1x32xf32> to vector<8x32xf32>
    %437 = arith.addf %434, %436 : vector<8x32xf32>
    %438 = arith.truncf %437 : vector<8x32xf32> to vector<8x32xbf16>
    %c0_153 = arith.constant 0 : index
    %c0_154 = arith.constant 0 : index
    %439 = vector.load %arg13[%c0_153, %c0_154] : memref<32x128xbf16, #tpu.memory_space<vmem>>, vector<32x128xbf16>
    %cst_155 = arith.constant dense<0.000000e+00> : vector<8x128xf32>
    %440 = tpu.matmul %438, %439, %cst_155 {dimension_numbers = #tpu.dot_dimension_numbers<[1], [0], [0], [1], [0, 0, 1, 1], [], []>} : vector<8x32xbf16>, vector<32x128xbf16>, vector<8x128xf32> -> vector<8x128xf32>
    %c0_156 = arith.constant 0 : index
    %c0_157 = arith.constant 0 : index
    %441 = vector.load %arg14[%c0_156, %c0_157] : memref<1x128xf32, #tpu.memory_space<vmem>>, vector<1x128xf32>
    %442 = vector.broadcast %441 : vector<1x128xf32> to vector<8x128xf32>
    %443 = arith.addf %440, %442 : vector<8x128xf32>
    %c0_158 = arith.constant 0 : index
    %c0_159 = arith.constant 0 : index
    %c0_160 = arith.constant 0 : index
    %444 = vector.load %arg15[%c0_158, %c0_159, %c0_160] : memref<1x8x128xf32, #tpu.memory_space<vmem>>, vector<1x8x128xf32>
    %445 = vector.shape_cast %444 : vector<1x8x128xf32> to vector<8x128xf32>
    %446 = vector.shape_cast %443 : vector<8x128xf32> to vector<1x8x128xf32>
    tpu.vector_store %arg15[%c0_158, %c0_159, %c0_160], %446 {strides = array<i32>} : memref<1x8x128xf32, #tpu.memory_space<vmem>>, vector<1x8x128xf32>,
    return
  }
  func.func @transform_0(%arg0: i32) -> (i32, i32, i32) {
    %c0_i32 = arith.constant 0 : i32
    %c0_i32_0 = arith.constant 0 : i32
    %c0_i32_1 = arith.constant 0 : i32
    return %arg0, %c0_i32, %c0_i32_0 : i32, i32, i32
  }
  func.func @transform_1(%arg0: i32) -> (i32, i32, i32) {
    %c0_i32 = arith.constant 0 : i32
    %c0_i32_0 = arith.constant 0 : i32
    %c0_i32_1 = arith.constant 0 : i32
    %c0_i32_2 = arith.constant 0 : i32
    return %c0_i32, %c0_i32_0, %c0_i32_1 : i32, i32, i32
  }
  func.func @transform_2(%arg0: i32) -> (i32, i32, i32) {
    %c0_i32 = arith.constant 0 : i32
    %c0_i32_0 = arith.constant 0 : i32
    %c0_i32_1 = arith.constant 0 : i32
    %c0_i32_2 = arith.constant 0 : i32
    return %c0_i32, %c0_i32_0, %c0_i32_1 : i32, i32, i32
  }
  func.func @transform_3(%arg0: i32) -> (i32, i32, i32) {
    %c0_i32 = arith.constant 0 : i32
    %c0_i32_0 = arith.constant 0 : i32
    %c0_i32_1 = arith.constant 0 : i32
    %c0_i32_2 = arith.constant 0 : i32
    return %c0_i32, %c0_i32_0, %c0_i32_1 : i32, i32, i32
  }
  func.func @transform_4(%arg0: i32) -> (i32, i32, i32) {
    %c0_i32 = arith.constant 0 : i32
    %c0_i32_0 = arith.constant 0 : i32
    %c0_i32_1 = arith.constant 0 : i32
    %c0_i32_2 = arith.constant 0 : i32
    return %c0_i32, %c0_i32_0, %c0_i32_1 : i32, i32, i32
  }
  func.func @transform_5(%arg0: i32) -> (i32, i32, i32) {
    %c0_i32 = arith.constant 0 : i32
    %c0_i32_0 = arith.constant 0 : i32
    %c0_i32_1 = arith.constant 0 : i32
    %c0_i32_2 = arith.constant 0 : i32
    return %c0_i32, %c0_i32_0, %c0_i32_1 : i32, i32, i32
  }
  func.func @transform_6(%arg0: i32) -> (i32, i32, i32) {
    %c0_i32 = arith.constant 0 : i32
    %c0_i32_0 = arith.constant 0 : i32
    %c0_i32_1 = arith.constant 0 : i32
    %c0_i32_2 = arith.constant 0 : i32
    return %c0_i32, %c0_i32_0, %c0_i32_1 : i32, i32, i32
  }
  func.func @transform_7(%arg0: i32) -> (i32, i32, i32) {
    %c0_i32 = arith.constant 0 : i32
    %c0_i32_0 = arith.constant 0 : i32
    %c0_i32_1 = arith.constant 0 : i32
    %c0_i32_2 = arith.constant 0 : i32
    return %c0_i32, %c0_i32_0, %c0_i32_1 : i32, i32, i32
  }
  func.func @transform_8(%arg0: i32) -> (i32, i32, i32) {
    %c0_i32 = arith.constant 0 : i32
    %c0_i32_0 = arith.constant 0 : i32
    %c0_i32_1 = arith.constant 0 : i32
    %c0_i32_2 = arith.constant 0 : i32
    return %c0_i32, %c0_i32_0, %c0_i32_1 : i32, i32, i32
  }
  func.func @transform_9(%arg0: i32) -> (i32, i32, i32) {
    %c0_i32 = arith.constant 0 : i32
    %c0_i32_0 = arith.constant 0 : i32
    %c0_i32_1 = arith.constant 0 : i32
    %c0_i32_2 = arith.constant 0 : i32
    return %c0_i32, %c0_i32_0, %c0_i32_1 : i32, i32, i32
  }
  func.func @transform_10(%arg0: i32) -> (i32, i32) {
    %c0_i32 = arith.constant 0 : i32
    %c0_i32_0 = arith.constant 0 : i32
    %c0_i32_1 = arith.constant 0 : i32
    return %c0_i32, %c0_i32_0 : i32, i32
  }
  func.func @transform_11(%arg0: i32) -> (i32, i32) {
    %c0_i32 = arith.constant 0 : i32
    %c0_i32_0 = arith.constant 0 : i32
    %c0_i32_1 = arith.constant 0 : i32
    return %c0_i32, %c0_i32_0 : i32, i32
  }
  func.func @transform_12(%arg0: i32) -> (i32, i32) {
    %c0_i32 = arith.constant 0 : i32
    %c0_i32_0 = arith.constant 0 : i32
    %c0_i32_1 = arith.constant 0 : i32
    return %c0_i32, %c0_i32_0 : i32, i32
  }
  func.func @transform_13(%arg0: i32) -> (i32, i32) {
    %c0_i32 = arith.constant 0 : i32
    %c0_i32_0 = arith.constant 0 : i32
    %c0_i32_1 = arith.constant 0 : i32
    return %c0_i32, %c0_i32_0 : i32, i32
  }
  func.func @transform_14(%arg0: i32) -> (i32, i32, i32) {
    %c0_i32 = arith.constant 0 : i32
    %c0_i32_0 = arith.constant 0 : i32
    %c0_i32_1 = arith.constant 0 : i32
    return %arg0, %c0_i32, %c0_i32_0 : i32, i32, i32
  }
}

</mosaic_0001>

<bundles_post_ra>
// kernel: mamba_for_token_classification.1
= control target key start
LH: loop header
LB: loop body
LE: loop exit
PB: predicated region body
PF: predicated region fallthrough
CT: control target
= control target key end

     0   :  { %s3677_s29 = smov 0   ;;  %s4240_s0 = inlined_call_operand.vmem [shape: f32[2,8,32], index: 0, kind: input, shape index: {}]   ;;  %s4241_s1 = inlined_call_operand.vmem [shape: f32[2,1,32], index: 1, kind: input, shape index: {}]   ;;  %s4242_s2 = inlined_call_operand.vmem [shape: bf16[2,32,128], index: 2, kind: input, shape index: {}]   ;;  %s4243_s3 = inlined_call_operand.vmem [shape: f32[2,4,64], index: 3, kind: input, shape index: {}]   ;;  %s4244_s4 = inlined_call_operand.vmem [shape: f32[2,1,64], index: 4, kind: input, shape index: {}]   ;;  %s4245_s5 = inlined_call_operand.vmem [shape: bf16[2,64,96], index: 5, kind: input, shape index: {}]   ;;  %s4246_s6 = inlined_call_operand.vmem [shape: f32[2,1,64], index: 6, kind: input, shape index: {}]   ;;  %s4247_s7 = inlined_call_operand.vmem [shape: f32[2,16,64], index: 7, kind: input, shape index: {}]   ;;  %s4248_s8 = inlined_call_operand.vmem [shape: f32[2,1,64], index: 8, kind: input, shape index: {}]   ;;  %s4249_s9 = inlined_call_operand.vmem [shape: bf16[2,64,32], index: 9, kind: input, shape index: {}]   ;;  %s4250_s10 = inlined_call_operand.vmem [shape: f32[1,32], index: 10, kind: input, shape index: {}]   ;;  %s4251_s11 = inlined_call_operand.vmem [shape: f32[1,32], index: 11, kind: input, shape index: {}]   ;;  %s4252_s12 = inlined_call_operand.vmem [shape: bf16[32,128], index: 12, kind: input, shape index: {}]   ;;  %s4253_s13 = inlined_call_operand.vmem [shape: f32[1,128], index: 13, kind: input, shape index: {}]   ;;  %s4254_s14 = inlined_call_operand.vmem [shape: f32[2,8,128], index: 14, kind: output, shape index: {}]  }
   0x1 LB: > { %s3006_s30 = sadd.s32 4294967295, %s3586_s29   ;;  %p3010_p0 = scmp.ge.s32.totalorder %s3586_s29, 1  ;;  %s3586_s29 = sphi %s3677_s29, %s24_s29  }
   0x2   : > { %p411_p1 = scmp.lt.s32.totalorder %s3586_s29, 3 }
   0x4   : > { %p412_p2 = pnand %p3010_p0, %p411_p1 }
   0x5   : > { %p455_p3 = scmp.lt.s32.totalorder (!%p412_p2), %s3006_s30, 1  ;;  %vm468_vm0 = vcmask (!%p412_p2), 261120   ;;  %v3464_v3 = vld [vmem:[%s4242_s2] sm:$0xff] (!%p412_p2)   ;;  %v3588_v4 = vmov (!%p412_p2), 0.0   ;;  %vm3589_vm1 = vmmov (!%p412_p2), 0   ;;  %v3465_v5 = vld [vmem:[%s4242_s2 + $0x8] sm:$0xff] (!%p412_p2)   ;;  %v548_v18 = vlaneseq (!%p412_p2) }
   0x6   : > { %415 = sbr.rel (%p412_p2) target bundleno = 3383 (0xd37), region = 76  ;;  %3179 = vmatprep.subr.bf16.mxu0 (!%p412_p2), %v3588_v4  ;;  %3183 = vmatprep.mubr.msk.bf16.mxu0 (!%p412_p2), %vm3589_vm1, %v3588_v4  ;;  %vm465_vm2 = vcmask (!%p412_p2), 523264   ;;  %v3013_v10 = vld [vmem:[%s4241_s1] ss:$0 sm:$0xff] (!%p412_p2)  ;;  %v3467_v15 = vld [vmem:[%s4245_s5 + $0x8] sm:$0xff] (!%p412_p2)   ;;  %v3468_v16 = vld [vmem:[%s4245_s5 + $0x10] sm:$0xff] (!%p412_p2)  }
   0x7   : > { %3180 = vmatpush3.bf16.msra.mxu0 (!%p412_p2), %v3464_v3  ;;  %3187 = vmatprep.subr.bf16.mxu1 (!%p412_p2), %v3588_v4  ;;  %466 = vst.msk [vmem:[#allocation2] sm:$0xff] (!%p412_p2), %vm465_vm2, %v3588_v4  ;;  %v3466_v14 = vld [vmem:[%s4245_s5] sm:$0xff] (!%p412_p2)   ;;  %v3469_v17 = vld [vmem:[%s4245_s5 + $0x18] sm:$0xff] (!%p412_p2)   ;;  %v3735_v19 = vshrl.u32 (!%p412_p2), %v548_v18, 7  ;;  %s3590_s24 = smov (!%p412_p2), 96   ;;  %v3591_v55 = vmov (!%p412_p2), 1  }
   0x8   : > { %3181 = vmatprep.subr.bf16.mxu0 (!%p412_p2), %v3588_v4  ;;  %3195 = vmatprep.mubr.msk.bf16.mxu1 (!%p412_p2), %vm3589_vm1, %v3588_v4  ;;  %v546_v25 = vld [vmem:[%s4243_s3] sm:$0xf] (!%p412_p2)  ;;  %v3592_v57 = vmov (!%p412_p2), 0   ;;  %v3593_v59 = vmov (!%p412_p2), 3   ;;  %v3594_v60 = vmov (!%p412_p2), 2   ;;  %v3595_v63 = vmov (!%p412_p2), 4  }
   0x9   : > { %3188 = vmatpush3.bf16.msra.mxu1 (!%p412_p2), %v3466_v14  ;;  %v3742_v22 = vsub.s32 (!%p412_p2), 0, %v3735_v19  ;;  %v3745_v23 = vsub.s32 (!%p412_p2), 1, %v3735_v19  ;;  %v3751_v27 = vsub.s32 (!%p412_p2), 2, %v3735_v19  ;;  %v3756_v30 = vsub.s32 (!%p412_p2), 3, %v3735_v19  ;;  %v3017_v43 = vld [vmem:[%s4244_s4] ss:$0 sm:$0xff] (!%p412_p2)  ;;  %3434 = vset.pattern.permute.xlu0 (!%p412_p2), %v3591_v55 }
   0xa   : > { %3189 = vmatprep.subr.bf16.mxu1 (!%p412_p2), %v3588_v4  ;;  %s3599_s25 = smov (!%p412_p2), 112   ;;  %s3601_s26 = smov (!%p412_p2), 64   ;;  %v3024_v14 = vld [vmem:[%s4246_s6] ss:$0 sm:$0xff] (!%p412_p2)  ;;  %vm758_vm5 = vcmask (!%p412_p2), 130048   ;;  %vm831_vm6 = vcmask (!%p412_p2), 516096  }
   0xb   : > { %3182 = vmatpush3.bf16.msra.mxu0 (!%p412_p2), %v3465_v5  ;;  %v551_v28 = vrot.slane (!%p412_p2), %v546_v25, %v3742_v22  ;;  %v557_v29 = vrot.slane (!%p412_p2), %v546_v25, %v3745_v23  ;;  %v564_v31 = vrot.slane (!%p412_p2), %v546_v25, %v3751_v27  ;;  %v571_v37 = vrot.slane (!%p412_p2), %v546_v25, %v3756_v30 }
   0xc   : > { %v3598_v5 = vmov (!%p412_p2), 6  }
   0xd   : > { %s4256_s30 = smov (!%p455_p3, %s3006_s30), 1  ;;  %3190 = vmatpush3.bf16.msra.mxu1 %v3467_v15 }
   0xe   : > { %s3011_s15 = sshll.u32 %s4256_s30, 3  ;;  %3191 = vmatprep.subr.bf16.mxu1 %v3588_v4 }
   0xf   : > { %s458_s18 = scalar_lea.vmem %s4240_s0, %s3011_s15 }
  0x10   : > { %v3693_v0 = vld [vmem:[%s458_s18] sm:$0xff] }
  0x11   : > { %v467_v1 = vmul.f32 %v3693_v0, %v3693_v0  ;;  %3192 = vmatpush3.bf16.msra.mxu1 %v3468_v16 }
  0x12   : > { %3193 = vmatprep.subr.bf16.mxu1 %v3588_v4 }
  0x13   : > { %v469_v2 = vsel %vm468_vm0, %v467_v1, 0.0  ;;  %v3596_v1 = vmov 5  }
  0x14   : > { %470 = vadd.xlane.f32.xlu0 %v469_v2  ;;  %v3597_v2 = vmov 0.0|0.0  }
  0x15   : > { %3194 = vmatpush3.bf16.msra.mxu1 %v3469_v17  ;;  %3366 = vmatprep.subr.bf16.mxu0 %v3597_v2 }
  0x16   : > { %3363 = vmatprep.subr.bf16.mxu1 %v3597_v2 }
  0xa1   : > { %v471_v6 = vpop.xlane.xlu0 %470 }
  0xa2   : > { %v473_v7 = vmul.f32 0.03125, %v471_v6 }
  0xa4   : > { %v474_v8 = vadd.f32 1e-06, %v473_v7 }
  0xa6   : > { %3486 = vrsqrt.f32 %v474_v8 }
  0xb0   : > { %v3487_v9 = vpop.eup %3486 }
  0xb1   : > { %v476_v11 = vmul.f32 %v3487_v9, %v3693_v0  ;;  %v3600_v9 = vmov 7  }
  0xb3   : > { %v484_v12 = vmul.f32 %v3013_v10, %v476_v11 }
  0xb5   : > { %v485_v13 = vpack.c.bf16 %v484_v12, %v484_v12 }
  0xb7   : > { %3184 = vmatmul.mubr.msk.bf16.vlgmr.msra.gmra.mrb[0].mxu0 %vm468_vm0, %v485_v13 }
  0xb8   : > { %3210 = vmatprep.mubr.msk.f32.mxu0 %vm3589_vm1, %v3588_v4 }
 0x18a   : > { %v3737_v20 = vpop.f32.mrb[0].mxu0 }
 0x18b   : > { %545 = vst.msk [vmem:[#allocation2 + $0x8] sm:$0xff] %vm465_vm2, %v3737_v20  ;;  %v3185_v21 = vpop.f32.mrb[1].mxu0  ;;  %v3034_v62 = vmul.f32 -1.442695, %v3737_v20 }
 0x18c   : > { %v542_v24 = vpop.f32.mrb[2].mxu0 }
 0x18d   : > { %v3186_v26 = vpop.f32.mrb[3].mxu0 }
 0x192   : > { %v547_v32 = vld [vmem:[#allocation2 + $0x5] sm:$0xff] }
 0x193   : > { %v553_v33 = vld [vmem:[#allocation2 + $0x6] sm:$0xff]  ;;  %v552_v35 = vmul.f32 %v551_v28, %v547_v32 }
 0x194   : > { %v560_v34 = vld [vmem:[#allocation2 + $0x7] sm:$0xff]  ;;  %v558_v36 = vmul.f32 %v557_v29, %v553_v33 }
 0x195   : > { %v567_v38 = vld [vmem:[#allocation2 + $0x8] sm:$0xff]  ;;  %v565_v40 = vmul.f32 %v564_v31, %v560_v34 }
 0x196   : > { %v559_v39 = vadd.f32 %v558_v36, %v552_v35  ;;  %v572_v42 = vmul.f32 %v571_v37, %v567_v38  ;;  %v3822_v38 = vld [vmem:[%s4247_s7] sm:$0xff] }
 0x198   : > { %v566_v41 = vadd.f32 %v565_v40, %v559_v39 }
 0x19a   : > { %v573_v44 = vadd.f32 %v572_v42, %v566_v41 }
 0x19c   : > { %v581_v45 = vadd.f32 %v3017_v43, %v573_v44  ;;  %v3831_v43 = vld [vmem:[%s4247_s7 + $0x8] sm:$0xff] }
 0x19e   : > { %v3018_v46 = vmul.f32 -1.442695, %v581_v45 }
 0x1a0   : > { %3488 = vpow2.f32 %v3018_v46 }
 0x1aa   : > { %v3489_v47 = vpop.eup %3488 }
 0x1ab   : > { %v585_v48 = vadd.f32 1.0, %v3489_v47 }
 0x1ad   : > { %3490 = vrcp.f32 %v585_v48 }
 0x1ae   : > { %3492 = vpow2.f32 %v3034_v62 }
 0x1b7   : > { %v3491_v49 = vpop.eup %3490 }
 0x1b8   : > { %v3763_v50 = vmul.f32 %v3491_v49, %v581_v45  ;;  %v3493_v3 = vpop.eup %3492 }
 0x1b9   : > { %v1574_v6 = vadd.f32 1.0, %v3493_v3  ;;  %v3848_v3 = vsub.s32 4, %v3735_v19 }
 0x1ba   : > { %v589_v51 = vpack.c.bf16 %v3763_v50, %v3763_v50 }
 0x1bb   : > { %3494 = vrcp.f32 %v1574_v6 }
 0x1bc   : > { %3196 = vmatmul.mubr.msk.bf16.vlgmr.msra.gmra.mrb[0].mxu1 %vm465_vm2, %v589_v51 }
 0x1bd   : > { %3203 = vmatprep.mubr.msk.f32.mxu1 %vm3589_vm1, %v3588_v4 }
 0x1c5   : > { %v3495_v11 = vpop.eup %3494 }
 0x1c6   : > { %v1577_v12 = vmul.f32 %v3495_v11, %v3737_v20 }
 0x28f   : > { %v3770_v52 = vpop.f32.mrb[0].mxu1 }
 0x290   : > { %665 = vxpose.xlu1.b32.start.end [1/1] (short) (narrow) %v3770_v52, 16  ;;  %705 = vrot.lane.b32.xlu0 %v3770_v52, %s3590_s24  ;;  %v3197_v53 = vpop.f32.mrb[1].mxu1  ;;  %v965_v7 = vrot.slane %v3770_v52, 2  ;;  %v1173_v8 = vrot.slane %v3770_v52, 4  ;;  %v1381_v10 = vrot.slane %v3770_v52, 6  ;;  %v861_v13 = vrot.slane %v3770_v52, 1 }
 0x291   : > { %v662_v54 = vpop.f32.mrb[2].mxu1  ;;  %v1069_v16 = vrot.slane %v3770_v52, 3  ;;  %v1277_v18 = vrot.slane %v3770_v52, 5  ;;  %v1485_v21 = vrot.slane %v3770_v52, 7 }
 0x292   : > { %v3198_v56 = vpop.f32.mrb[3].mxu1 }
 0x2ae   : > { %3433 = vset.pattern.permute.xlu1 %v3592_v57 }
 0x302   : > { %v706_v15 = vpop.permute.xlu0 %705 }
 0x303   : > { %v708_v17 = vadd.f32 %v3024_v14, %v706_v15 }
 0x305   : > { %v710_v20 = vmin.f32 %v708_v17, 20.0  ;;  %vm709_vm4 = vcmp.gt.f32.partialorder %v708_v17, 20.0 }
 0x307   : > { %v711_v24 = vmul.f32 1.442695, %v710_v20 }
 0x309   : > { %3496 = vpow2.f32 %v711_v24 }
 0x310   : > { %v681_v58 = vpop.trf.xlu1 }
 0x311   : > { %740 = vperm.xlu1 %3433, %v681_v58   ;;  %846 = vperm.xlu0 %3434, %v681_v58  }
 0x313   : > { %v3497_v25 = vpop.eup %3496 }
 0x314   : > { %v682_v61 = vpop.trf.xlu1  ;;  %v713_v26 = vadd.f32 1.0, %v3497_v25  ;;  %v716_v28 = vmul.f32 -0.5, %v3497_v25  ;;  %v719_v32 = vand.u32 2147483647, %v3497_v25 }
 0x315   : > { %3436 = vset.pattern.permute.xlu1 %v3593_v59  ;;  %3435 = vset.pattern.permute.xlu0 %v3594_v60 }
 0x316   : > { %1054 = vperm.xlu1 %3436, %v681_v58   ;;  %950 = vperm.xlu0 %3435, %v681_v58   ;;  %3498 = vlog2.f32 %v713_v26  ;;  %v717_v31 = vadd.f32 1.0, %v716_v28  ;;  %vm720_vm3 = vcmp.lt.f32.partialorder %v719_v32, 0.0004427343 }
 0x318   : > { %v718_v34 = vmul.f32 %v3497_v25, %v717_v31  ;;  %v3857_v25 = vsub.s32 5, %v3735_v19 }
 0x31a   : > { %3437 = vset.pattern.permute.xlu1 %v3595_v63  ;;  %3438 = vset.pattern.permute.xlu0 %v3592_v57 }
 0x31b   : > { %1158 = vperm.xlu1 %3437, %v681_v58   ;;  %745 = vperm.xlu0 %3438, %v682_v61  }
 0x31f   : > { %3439 = vset.pattern.permute.xlu1 %v3591_v55  ;;  %3441 = vset.pattern.permute.xlu0 %v3593_v59 }
 0x320   : > { %850 = vperm.xlu1 %3439, %v682_v61   ;;  %1058 = vperm.xlu0 %3441, %v682_v61   ;;  %v3499_v29 = vpop.eup %3498 }
 0x321   : > { %v715_v33 = vmul.f32 0.6931472, %v3499_v29 }
 0x323   : > { %v721_v35 = vsel %vm720_vm3, %v718_v34, %v715_v33 }
 0x324   : > { %3440 = vset.pattern.permute.xlu1 %v3594_v60  ;;  %3442 = vset.pattern.permute.xlu0 %v3596_v1  ;;  %v3815_v36 = vsel %vm709_vm4, %v708_v17, %v721_v35 }
 0x325   : > { %954 = vperm.xlu1 %3440, %v682_v61   ;;  %1262 = vperm.xlu0 %3442, %v681_v58   ;;  %v729_v37 = vrot.slane %v3815_v36, %v3742_v22  ;;  %v836_v40 = vrot.slane %v3815_v36, %v3745_v23  ;;  %v940_v44 = vrot.slane %v3815_v36, %v3751_v27 }
 0x326   : > { %v3839_v49 = vmul.f32 %v3815_v36, %v3763_v50  ;;  %v1044_v51 = vrot.slane %v3815_v36, %v3756_v30 }
 0x327   : > { %v730_v39 = vmul.f32 %v729_v37, %v3822_v38  ;;  %v837_v42 = vmul.f32 %v836_v40, %v3822_v38  ;;  %v731_v46 = vmul.f32 %v729_v37, %v3831_v43  ;;  %v941_v47 = vmul.f32 %v940_v44, %v3822_v38 }
 0x328   : > { %v751_v56 = vrot.slane %v3839_v49, %v3742_v22  ;;  %v1045_v62 = vmul.f32 %v1044_v51, %v3822_v38  ;;  %v1046_v24 = vmul.f32 %v1044_v51, %v3831_v43 }
 0x329   : > { %3443 = vset.pattern.permute.xlu1 %v3598_v5  ;;  %3447 = vset.pattern.permute.xlu0 %v3598_v5  ;;  %v732_v41 = vmul.f32 1.442695, %v730_v39  ;;  %v839_v45 = vmul.f32 1.442695, %v837_v42  ;;  %v734_v48 = vmul.f32 1.442695, %v731_v46  ;;  %v1252_v39 = vrot.slane %v3815_v36, %v3857_v25 }
 0x32a   : > { %1366 = vperm.xlu1 %3443, %v681_v58   ;;  %1370 = vperm.xlu0 %3447, %v682_v61   ;;  %v943_v53 = vmul.f32 1.442695, %v941_v47  ;;  %v1047_v14 = vmul.f32 1.442695, %v1045_v62  ;;  %v1049_v33 = vmul.f32 1.442695, %v1046_v24 }
 0x32b   : > { %3500 = vpow2.f32 %v732_v41  ;;  %v960_v41 = vrot.slane %v3839_v49, %v3751_v27  ;;  %v3868_v46 = vsub.s32 6, %v3735_v19 }
 0x32c   : > { %3502 = vpow2.f32 %v839_v45 }
 0x32d   : > { %3504 = vpow2.f32 %v734_v48 }
 0x32e   : > { %3444 = vset.pattern.permute.xlu1 %v3595_v63  ;;  %756 = vrot.lane.b32.xlu0 %v3770_v52, %s3599_s25  ;;  %v838_v52 = vmul.f32 %v836_v40, %v3831_v43  ;;  %3506 = vpow2.f32 %v943_v53 }
 0x32f   : > { %1162 = vperm.xlu1 %3444, %v682_v61  }
 0x330   : > { %v841_v6 = vmul.f32 1.442695, %v838_v52 }
 0x332   : > { %966 = vrot.lane.b32.xlu0 %v965_v7, %s3599_s25  ;;  %3508 = vpow2.f32 %v841_v6  ;;  %v1253_v6 = vmul.f32 %v1252_v39, %v3822_v38 }
 0x333   : > { %3445 = vset.pattern.permute.xlu1 %v3596_v1  ;;  %3510 = vpow2.f32 %v1047_v14 }
 0x334   : > { %1266 = vperm.xlu1 %3445, %v682_v61  }
 0x335   : > { %v3501_v54 = vpop.eup %3500 }
 0x336   : > { %1174 = vrot.lane.b32.xlu0 %v1173_v8, %s3599_s25  ;;  %v736_v7 = vmul.f32 0.0, %v3501_v54 }
 0x338   : > { %3446 = vset.pattern.permute.xlu1 %v3600_v9 }
 0x339   : > { %1470 = vperm.xlu1 %3446, %v681_v58  }
 0x33a   : > { %1382 = vrot.lane.b32.xlu0 %v1381_v10, %s3599_s25  ;;  %v942_v10 = vmul.f32 %v940_v44, %v3831_v43 }
 0x33c   : > { %v945_v20 = vmul.f32 1.442695, %v942_v10 }
 0x33d   : > { %1474 = vperm.xlu1 %3446, %v682_v61  }
 0x33e   : > { %1579 = vrot.lane.b32.xlu0 %v1577_v12, %s3601_s26  ;;  %v3503_v12 = vpop.eup %3502  ;;  %3512 = vpow2.f32 %v945_v20 }
 0x33f   : > { %v3505_v26 = vpop.eup %3504  ;;  %3514 = vpow2.f32 %v1049_v33 }
 0x340   : > { %v3507_v34 = vpop.eup %3506  ;;  %v737_v35 = vmul.f32 0.0, %v3505_v26  ;;  %v1255_v26 = vmul.f32 1.442695, %v1253_v6 }
 0x341   : > { %862 = vrot.lane.b32.xlu1 %v861_v13, %s3599_s25  ;;  %v856_v13 = vrot.slane %v3839_v49, %v3745_v23  ;;  %v3509_v47 = vpop.eup %3508 }
 0x342   : > { %3448 = vset.pattern.permute.xlu1 %v3592_v57 }
 0x345   : > { %1070 = vrot.lane.b32.xlu1 %v1069_v16, %s3599_s25 }
 0x349   : > { %1278 = vrot.lane.b32.xlu1 %v1277_v18, %s3599_s25  ;;  %v1148_v18 = vrot.slane %v3815_v36, %v3848_v3 }
 0x34b   : > { %v1149_v29 = vmul.f32 %v1148_v18, %v3822_v38  ;;  %v1150_v42 = vmul.f32 %v1148_v18, %v3831_v43 }
 0x34d   : > { %1486 = vrot.lane.b32.xlu1 %v1485_v21, %s3599_s25  ;;  %v1151_v44 = vmul.f32 1.442695, %v1149_v29  ;;  %v1153_v62 = vmul.f32 1.442695, %v1150_v42 }
 0x34f   : > { %3516 = vpow2.f32 %v1151_v44 }
 0x350   : > { %3518 = vpow2.f32 %v1153_v62 }
 0x390   : > { %v741_v58 = vpop.permute.xlu1 %740  ;;  %v847_v61 = vpop.permute.xlu0 %846 }
 0x391   : > { %v752_v8 = vmul.f32 %v751_v56, %v741_v58  ;;  %v857_v21 = vmul.f32 %v856_v13, %v847_v61 }
 0x393   : > { %v754_v11 = vadd.f32 %v752_v8, %v736_v7  ;;  %v1356_v7 = vrot.slane %v3815_v36, %v3868_v46  ;;  %v3511_v8 = vpop.eup %3510 }
 0x395   : > { %v843_v15 = vmul.f32 %v3503_v12, %v754_v11  ;;  %v1055_v16 = vpop.permute.xlu1 %1054  ;;  %v951_v17 = vpop.permute.xlu0 %950  ;;  %v1064_v12 = vrot.slane %v3839_v49, %v3756_v30  ;;  %v1358_v29 = vmul.f32 %v1356_v7, %v3831_v43 }
 0x396   : > { %v961_v48 = vmul.f32 %v960_v41, %v951_v17 }
 0x397   : > { %v859_v28 = vadd.f32 %v857_v21, %v843_v15  ;;  %v3880_v15 = vsub.s32 7, %v3735_v19 }
 0x399   : > { %v947_v40 = vmul.f32 %v3507_v34, %v859_v28 }
 0x39a   : > { %v3860_v31 = vpop.permute.xlu1 %1158  ;;  %v746_v32 = vpop.permute.xlu0 %745 }
 0x39b   : > { %v753_v37 = vmul.f32 %v751_v56, %v746_v32  ;;  %v1254_v56 = vmul.f32 %v1252_v39, %v3831_v43  ;;  %v3871_v58 = vadd.f32 %v961_v48, %v947_v40  ;;  %v1065_v32 = vmul.f32 %v1064_v12, %v1055_v16 }
 0x39c   : > { %v1361_v16 = vmul.f32 1.442695, %v1358_v29 }
 0x39d   : > { %v755_v45 = vadd.f32 %v753_v37, %v737_v35  ;;  %v1257_v14 = vmul.f32 1.442695, %v1254_v56  ;;  %v1357_v35 = vmul.f32 %v1356_v7, %v3822_v38 }
 0x39f   : > { %v3364_v51 = vpack.c.bf16 %v755_v45, %v754_v11  ;;  %v851_v52 = vpop.permute.xlu1 %850  ;;  %v844_v53 = vmul.f32 %v3509_v47, %v755_v45  ;;  %v1059_v54 = vpop.permute.xlu0 %1058  ;;  %3520 = vpow2.f32 %v1257_v14  ;;  %v1168_v47 = vrot.slane %v3839_v49, %v3848_v3 }
 0x3a0   : > { %v858_v61 = vmul.f32 %v856_v13, %v851_v52  ;;  %v3513_v11 = vpop.eup %3512  ;;  %v1051_v13 = vmul.f32 %v3511_v8, %v3871_v58  ;;  %v1066_v37 = vmul.f32 %v1064_v12, %v1059_v54  ;;  %3522 = vpow2.f32 %v1255_v26 }
 0x3a1   : > { %3365 = vmatpush3.bf16.msra.mxu1 %v3364_v51  ;;  %v3515_v34 = vpop.eup %3514  ;;  %v1359_v48 = vmul.f32 1.442695, %v1357_v35  ;;  %3524 = vpow2.f32 %v1361_v16  ;;  %v1169_v54 = vmul.f32 %v1168_v47, %v3860_v31  ;;  %v1272_v31 = vrot.slane %v3839_v49, %v3857_v25 }
 0x3a2   : > { %v860_v10 = vadd.f32 %v858_v61, %v844_v53  ;;  %3372 = vmatprep.subr.bf16.mxu1 %v3597_v2  ;;  %v1067_v19 = vadd.f32 %v1065_v32, %v1051_v13  ;;  %v3517_v42 = vpop.eup %3516  ;;  %v1376_v32 = vrot.slane %v3839_v49, %v3868_v46 }
 0x3a3   : > { %v3519_v53 = vpop.eup %3518  ;;  %3526 = vpow2.f32 %v1359_v48 }
 0x3a4   : > { %v3367_v17 = vpack.c.bf16 %v860_v10, %v859_v28  ;;  %v955_v18 = vpop.permute.xlu1 %954  ;;  %v948_v20 = vmul.f32 %v3513_v11, %v860_v10  ;;  %v1263_v21 = vpop.permute.xlu0 %1262  ;;  %v1460_v28 = vrot.slane %v3815_v36, %v3880_v15  ;;  %v1155_v45 = vmul.f32 %v3517_v42, %v1067_v19 }
 0x3a5   : > { %v962_v24 = vmul.f32 %v960_v41, %v955_v18 }
 0x3a6   : > { %3368 = vmatpush3.bf16.msra.mxu0 %v3367_v17  ;;  %v1462_v36 = vmul.f32 %v1460_v28, %v3831_v43  ;;  %v1171_v6 = vadd.f32 %v1169_v54, %v1155_v45  ;;  %v1461_v8 = vmul.f32 %v1460_v28, %v3822_v38  ;;  %v1273_v17 = vmul.f32 %v1272_v31, %v1263_v21 }
 0x3a7   : > { %v3884_v33 = vadd.f32 %v962_v24, %v948_v20  ;;  %3369 = vmatprep.subr.bf16.mxu0 %v3597_v2  ;;  %v1480_v21 = vrot.slane %v3839_v49, %v3880_v15 }
 0x3a8   : > { %v1465_v43 = vmul.f32 1.442695, %v1462_v36  ;;  %v1463_v20 = vmul.f32 1.442695, %v1461_v8 }
 0x3a9   : > { %v1052_v39 = vmul.f32 %v3515_v34, %v3884_v33  ;;  %v1367_v40 = vpop.permute.xlu1 %1366  ;;  %v1371_v41 = vpop.permute.xlu0 %1370 }
 0x3aa   : > { %v3521_v10 = vpop.eup %3520  ;;  %3528 = vpow2.f32 %v1465_v43  ;;  %v3470_v43 = vld [vmem:[%s4249_s9] sm:$0xff]  }
 0x3ab   : > { %v1068_v44 = vadd.f32 %v1066_v37, %v1052_v39  ;;  %v3523_v11 = vpop.eup %3522  ;;  %3530 = vpow2.f32 %v1463_v20  ;;  %v1377_v37 = vmul.f32 %v1376_v32, %v1367_v40 }
 0x3ac   : > { %v1259_v13 = vmul.f32 %v3523_v11, %v1171_v6  ;;  %v3525_v26 = vpop.eup %3524  ;;  %v3473_v11 = vld [vmem:[%s4249_s9 + $0x18] sm:$0xff]  }
 0x3ad   : > { %v757_v51 = vpop.permute.xlu0 %756  ;;  %v3373_v52 = vpack.c.bf16 %v1068_v44, %v1067_v19  ;;  %v1156_v61 = vmul.f32 %v3519_v53, %v1068_v44  ;;  %v1378_v19 = vmul.f32 %v1376_v32, %v1371_v41  ;;  %v3527_v35 = vpop.eup %3526  ;;  %v3370_v44 = vpack.c.bf16 %v3884_v33, %v3871_v58 }
 0x3ae   : > { %v1163_v56 = vpop.permute.xlu1 %1162  ;;  %3204 = vmatmul.mubr.msk.f32.vlgmr.msra.gmra.mrb[4].mxu1 %vm758_vm5, %v757_v51  ;;  %v1275_v29 = vadd.f32 %v1273_v17, %v1259_v13 }
 0x3af   : > { %v1170_v62 = vmul.f32 %v1168_v47, %v1163_v56  ;;  %3374 = vmatpush3.bf16.msra.mxu1 %v3373_v52  ;;  %3224 = vmatprep.mubr.msk.f32.mxu1 %vm3589_vm1, %v3588_v4 }
 0x3b0   : > { %3378 = vmatprep.subr.bf16.mxu1 %v3597_v2  ;;  %v1363_v28 = vmul.f32 %v3527_v35, %v1275_v29 }
 0x3b1   : > { %v1172_v7 = vadd.f32 %v1170_v62, %v1156_v61  ;;  %v967_v47 = vpop.permute.xlu0 %966 }
 0x3b2   : > { %v1379_v45 = vadd.f32 %v1377_v37, %v1363_v28 }
 0x3b3   : > { %v1267_v12 = vpop.permute.xlu1 %1266  ;;  %v1260_v14 = vmul.f32 %v3521_v10, %v1172_v7  ;;  %v3376_v49 = vpack.c.bf16 %v1172_v7, %v1171_v6  ;;  %v3471_v10 = vld [vmem:[%s4249_s9 + $0x8] sm:$0xff]  }
 0x3b4   : > { %v1274_v18 = vmul.f32 %v1272_v31, %v1267_v12  ;;  %v3529_v42 = vpop.eup %3528  ;;  %v3472_v31 = vld [vmem:[%s4249_s9 + $0x10] sm:$0xff]  }
 0x3b5   : > { %v3531_v40 = vpop.eup %3530  ;;  %v1175_v33 = vpop.permute.xlu0 %1174 }
 0x3b6   : > { %v1276_v24 = vadd.f32 %v1274_v18, %v1260_v14  ;;  %v1467_v53 = vmul.f32 %v3531_v40, %v1379_v45 }
 0x3b8   : > { %v1364_v38 = vmul.f32 %v3525_v26, %v1276_v24  ;;  %v1471_v34 = vpop.permute.xlu1 %1470  ;;  %v3379_v36 = vpack.c.bf16 %v1276_v24, %v1275_v29 }
 0x3b9   : > { %v1481_v41 = vmul.f32 %v1480_v21, %v1471_v34  ;;  %v1383_v7 = vpop.permute.xlu0 %1382 }
 0x3ba   : > { %v1380_v16 = vadd.f32 %v1378_v19, %v1364_v38 }
 0x3bb   : > { %v1483_v56 = vadd.f32 %v1481_v41, %v1467_v53  ;;  %v3475_v53 = vld [vmem:[%s4242_s2 + $0x18] sm:$0xff]  }
 0x3bc   : > { %v1475_v39 = vpop.permute.xlu1 %1474  ;;  %v1468_v48 = vmul.f32 %v3529_v42, %v1380_v16  ;;  %v3382_v6 = vpack.c.bf16 %v1380_v16, %v1379_v45 }
 0x3bd   : > { %v1482_v51 = vmul.f32 %v1480_v21, %v1475_v39  ;;  %v3033_v39 = vld [vmem:[%s4248_s8] ss:$0 sm:$0xff] }
 0x3be   : > { %v1569_v16 = vmul.f32 %v3033_v39, %v3763_v50 }
 0x3bf   : > { %v1484_v54 = vadd.f32 %v1482_v51, %v1468_v48 }
 0x3c0   : > { %v863_v52 = vpop.permute.xlu1 %862 }
 0x3c1   : > { %3211 = vmatmul.mubr.msk.f32.vlgmr.msra.gmra.mrb[4].mxu0 %vm758_vm5, %v863_v52  ;;  %v3385_v61 = vpack.c.bf16 %v1484_v54, %v1483_v56  ;;  %v3041_v56 = vld [vmem:[%s4241_s1 + $0x1] ss:$0 sm:$0xff] }
 0x3c2   : > { %3371 = vmatpush3.bf16.msra.mxu0 %v3370_v44  ;;  %3217 = vmatprep.mubr.msk.f32.mxu0 %vm3589_vm1, %v3588_v4  ;;  %v1580_v44 = vpop.permute.xlu0 %1579 }
 0x3c3   : > { %3375 = vmatprep.subr.bf16.mxu0 %v3597_v2 }
 0x3c4   : > { %v1071_v58 = vpop.permute.xlu1 %1070 }
 0x3c5   : > { %3218 = vmatmul.mubr.msk.f32.vlgmr.msra.gmra.mrb[6].mxu0 %vm758_vm5, %v967_v47  ;;  %3225 = vmatmul.mubr.msk.f32.vlgmr.msra.gmra.mrb[6].mxu1 %vm758_vm5, %v1071_v58 }
 0x3c6   : > { %3377 = vmatpush3.bf16.msra.mxu0 %v3376_v49  ;;  %3380 = vmatpush3.bf16.msra.mxu1 %v3379_v36  ;;  %v3474_v36 = vld [vmem:[%s4242_s2 + $0x10] sm:$0xff]  }
 0x3c7   : > { %3231 = vmatprep.mubr.msk.f32.mxu0 %vm3589_vm1, %v3588_v4  ;;  %3238 = vmatprep.mubr.msk.f32.mxu1 %vm3589_vm1, %v3588_v4 }
 0x3c8   : > { %3381 = vmatprep.subr.bf16.mxu0 %v3597_v2  ;;  %3384 = vmatprep.subr.bf16.mxu1 %v3597_v2  ;;  %v1279_v62 = vpop.permute.xlu1 %1278 }
 0x3c9   : > { %3232 = vmatmul.mubr.msk.f32.vlgmr.msra.gmra.mrb[8].mxu0 %vm758_vm5, %v1175_v33  ;;  %3239 = vmatmul.mubr.msk.f32.vlgmr.msra.gmra.mrb[8].mxu1 %vm758_vm5, %v1279_v62 }
 0x3ca   : > { %3383 = vmatpush3.bf16.msra.mxu0 %v3382_v6  ;;  %3386 = vmatpush3.bf16.msra.mxu1 %v3385_v61 }
 0x3cb   : > { %3245 = vmatprep.mubr.msk.f32.mxu0 %vm3589_vm1, %v3588_v4  ;;  %3252 = vmatprep.mubr.msk.f32.mxu1 %vm3589_vm1, %v3588_v4 }
 0x3cc   : > { %v1487_v8 = vpop.permute.xlu1 %1486  ;;  %3255 = vmatprep.subr.bf16.mxu0 %v3588_v4  ;;  %3267 = vmatprep.subr.bf16.mxu1 %v3588_v4 }
 0x3cd   : > { %3246 = vmatmul.mubr.msk.f32.vlgmr.msra.gmra.mrb[10].mxu0 %vm758_vm5, %v1383_v7  ;;  %3253 = vmatmul.mubr.msk.f32.vlgmr.msra.gmra.mrb[10].mxu1 %vm758_vm5, %v1487_v8  ;;  %v3476_v7 = vld [vmem:[%s4245_s5 + $0x20] sm:$0xff]   ;;  %v3477_v8 = vld [vmem:[%s4245_s5 + $0x28] sm:$0xff]  }
 0x3ce   : > { %3263 = vmatprep.mubr.msk.bf16.mxu0 %vm3589_vm1, %v3588_v4  ;;  %3271 = vmatprep.mubr.msk.bf16.mxu1 %vm3589_vm1, %v3588_v4 }
 0x3cf   : > { %3256 = vmatpush3.bf16.msra.mxu0 %v3470_v43  ;;  %3268 = vmatpush3.bf16.msra.mxu1 %v3474_v36  ;;  %v3478_v43 = vld [vmem:[%s4245_s5 + $0x30] sm:$0xff]  }
 0x3d0   : > { %3257 = vmatprep.subr.bf16.mxu0 %v3588_v4  ;;  %3269 = vmatprep.subr.bf16.mxu1 %v3588_v4 }
 0x3d3   : > { %3258 = vmatpush3.bf16.msra.mxu0 %v3471_v10  ;;  %3270 = vmatpush3.bf16.msra.mxu1 %v3475_v53  ;;  %v3479_v10 = vld [vmem:[%s4245_s5 + $0x38] sm:$0xff]  }
 0x3d4   : > { %3259 = vmatprep.subr.bf16.mxu0 %v3588_v4  ;;  %3275 = vmatprep.subr.bf16.mxu1 %v3588_v4 }
 0x3d7   : > { %3260 = vmatpush3.bf16.msra.mxu0 %v3472_v31 }
 0x3d8   : > { %3261 = vmatprep.subr.bf16.mxu0 %v3588_v4 }
 0x3db   : > { %3262 = vmatpush3.bf16.msra.mxu0 %v3473_v11 }
 0x3dc   : > { %3387 = vmatprep.subr.bf16.mxu0 %v3597_v2 }
 0x481   : > { %v827_v12 = vpop.f32.mrb[4].mxu1 }
 0x482   : > { %832 = vst.msk [vmem:[#allocation3] sm:$0x1] %vm831_vm6, %v827_v12  ;;  %v3205_v14 = vpop.f32.mrb[5].mxu1 }
 0x483   : > { %v3049_v14 = vld [vmem:[%s4243_s3 + $0x4] sm:$0xf] }
 0x494   : > { %v932_v13 = vpop.f32.mrb[4].mxu0 }
 0x495   : > { %936 = vst.msk [vmem:[#allocation3 + $0x1] sm:$0x1] %vm831_vm6, %v932_v13  ;;  %v3212_v17 = vpop.f32.mrb[5].mxu0 }
 0x496   : > { %v1744_v17 = vrot.slane %v3049_v14, %v3742_v22 }
 0x498   : > { %v1036_v18 = vpop.f32.mrb[6].mxu0  ;;  %v1140_v20 = vpop.f32.mrb[6].mxu1 }
 0x499   : > { %1040 = vst.msk [vmem:[#allocation3 + $0x2] sm:$0x1] %vm831_vm6, %v1036_v18  ;;  %1144 = vst.msk [vmem:[#allocation3 + $0x3] sm:$0x1] %vm831_vm6, %v1140_v20  ;;  %v3219_v24 = vpop.f32.mrb[7].mxu0  ;;  %v3226_v26 = vpop.f32.mrb[7].mxu1  ;;  %v1750_v18 = vrot.slane %v3049_v14, %v3745_v23  ;;  %v1757_v20 = vrot.slane %v3049_v14, %v3751_v27 }
 0x49c   : > { %v1244_v29 = vpop.f32.mrb[8].mxu0  ;;  %v1348_v32 = vpop.f32.mrb[8].mxu1 }
 0x49d   : > { %1248 = vst.msk [vmem:[#allocation3 + $0x4] sm:$0x1] %vm831_vm6, %v1244_v29  ;;  %1352 = vst.msk [vmem:[#allocation3 + $0x5] sm:$0x1] %vm831_vm6, %v1348_v32  ;;  %v3233_v38 = vpop.f32.mrb[9].mxu0  ;;  %v3240_v34 = vpop.f32.mrb[9].mxu1 }
 0x49e   : > { %v1764_v34 = vrot.slane %v3049_v14, %v3756_v30 }
 0x4a0   : > { %v1452_v19 = vpop.f32.mrb[10].mxu0  ;;  %v1556_v35 = vpop.f32.mrb[10].mxu1 }
 0x4a1   : > { %1456 = vst.msk [vmem:[#allocation3 + $0x6] sm:$0x1] %vm831_vm6, %v1452_v19  ;;  %1560 = vst.msk [vmem:[#allocation3 + $0x7] sm:$0x1] %vm831_vm6, %v1556_v35  ;;  %v3247_v28 = vpop.f32.mrb[11].mxu0  ;;  %v3254_v37 = vpop.f32.mrb[11].mxu1 }
 0x4a8   : > { %v1561_v21 = vld [vmem:[#allocation3] sm:$0xff] }
 0x4a9   : > { %v1570_v42 = vadd.f32 %v1569_v16, %v1561_v21  ;;  %v3051_v16 = vld [vmem:[%s4244_s4 + $0x1] ss:$0 sm:$0xff] }
 0x4ab   : > { %v1582_v45 = vmul.f32 %v1580_v44, %v1570_v42 }
 0x4ad   : > { %v1583_v47 = vpack.c.bf16 %v1582_v45, %v1582_v45 }
 0x4af   : > { %3264 = vmatmul.mubr.msk.bf16.vlgmr.msra.gmra.mrb[12].mxu0 %vm465_vm2, %v1583_v47 }
 0x4b0   : > { %3291 = vmatprep.mubr.msk.f32.mxu0 %vm3589_vm1, %v3588_v4 }
 0x582   : > { %v1653_v48 = vpop.f32.mrb[12].mxu0 }
 0x583   : > { %v3966_v51 = vadd.f32 %v1653_v48, %v3693_v0  ;;  %v3265_v52 = vpop.f32.mrb[13].mxu0 }
 0x584   : > { %v1656_v41 = vpop.f32.mrb[14].mxu0 }
 0x585   : > { %v3266_v40 = vpop.f32.mrb[15].mxu0  ;;  %v1659_v50 = vmul.f32 %v3966_v51, %v3966_v51 }
 0x587   : > { %v1660_v49 = vsel %vm468_vm0, %v1659_v50, 0.0 }
 0x588   : > { %1661 = vadd.xlane.f32.xlu1 %v1660_v49 }
 0x615   : > { %v1662_v0 = vpop.xlane.xlu1 %1661 }
 0x616   : > { %v1663_v54 = vmul.f32 0.03125, %v1662_v0 }
 0x618   : > { %v1664_v58 = vadd.f32 1e-06, %v1663_v54 }
 0x61a   : > { %3532 = vrsqrt.f32 %v1664_v58 }
 0x624   : > { %v3533_v33 = vpop.eup %3532 }
 0x625   : > { %v1666_v61 = vmul.f32 %v3533_v33, %v3966_v51 }
 0x627   : > { %v1675_v62 = vmul.f32 %v3041_v56, %v1666_v61 }
 0x629   : > { %v1676_v6 = vpack.c.bf16 %v1675_v62, %v1675_v62 }
 0x62b   : > { %3272 = vmatmul.mubr.msk.bf16.vlgmr.msra.gmra.mrb[12].mxu1 %vm468_vm0, %v1676_v6 }
 0x62c   : > { %3283 = vmatprep.mubr.msk.bf16.mxu1 %vm3589_vm1, %v3588_v4  ;;  %3276 = vmatpush3.bf16.msra.mxu1 %v3476_v7 }
 0x62d   : > { %3277 = vmatprep.subr.bf16.mxu1 %v3588_v4 }
 0x630   : > { %3278 = vmatpush3.bf16.msra.mxu1 %v3477_v8 }
 0x631   : > { %3279 = vmatprep.subr.bf16.mxu1 %v3588_v4 }
 0x634   : > { %3280 = vmatpush3.bf16.msra.mxu1 %v3478_v43 }
 0x635   : > { %3281 = vmatprep.subr.bf16.mxu1 %v3588_v4 }
 0x638   : > { %3282 = vmatpush3.bf16.msra.mxu1 %v3479_v10 }
 0x639   : > { %3396 = vmatprep.subr.bf16.mxu1 %v3597_v2 }
 0x6fe   : > { %v4002_v31 = vpop.f32.mrb[12].mxu1 }
 0x6ff   : > { %1737 = vst.msk [vmem:[#allocation2 + $0x8] sm:$0xff] %vm465_vm2, %v4002_v31  ;;  %v3273_v11 = vpop.f32.mrb[13].mxu1 }
 0x700   : > { %v1734_v12 = vpop.f32.mrb[14].mxu1 }
 0x701   : > { %v3274_v13 = vpop.f32.mrb[15].mxu1 }
 0x706   : > { %v1740_v24 = vld [vmem:[#allocation2 + $0x5] sm:$0xff] }
 0x707   : > { %v1746_v26 = vld [vmem:[#allocation2 + $0x6] sm:$0xff]  ;;  %v1745_v32 = vmul.f32 %v1744_v17, %v1740_v24 }
 0x708   : > { %v1753_v29 = vld [vmem:[#allocation2 + $0x7] sm:$0xff]  ;;  %v1751_v38 = vmul.f32 %v1750_v18, %v1746_v26 }
 0x709   : > { %v1760_v19 = vld [vmem:[#allocation2 + $0x8] sm:$0xff]  ;;  %v1758_v28 = vmul.f32 %v1757_v20, %v1753_v29  ;;  %v4077_v29 = vld [vmem:[%s4247_s7 + $0x18] sm:$0xff] }
 0x70a   : > { %v1752_v35 = vadd.f32 %v1751_v38, %v1745_v32  ;;  %v1765_v39 = vmul.f32 %v1764_v34, %v1760_v19 }
 0x70c   : > { %v1759_v37 = vadd.f32 %v1758_v28, %v1752_v35 }
 0x70e   : > { %v1766_v21 = vadd.f32 %v1765_v39, %v1759_v37 }
 0x710   : > { %v1775_v42 = vadd.f32 %v3051_v16, %v1766_v21 }
 0x712   : > { %v3052_v44 = vmul.f32 -1.442695, %v1775_v42 }
 0x714   : > { %3534 = vpow2.f32 %v3052_v44 }
 0x71e   : > { %v3535_v45 = vpop.eup %3534 }
 0x71f   : > { %v1779_v47 = vadd.f32 1.0, %v3535_v45 }
 0x721   : > { %3536 = vrcp.f32 %v1779_v47 }
 0x72b   : > { %v3537_v48 = vpop.eup %3536 }
 0x72c   : > { %v4016_v52 = vmul.f32 %v3537_v48, %v1775_v42 }
 0x72e   : > { %v1783_v41 = vpack.c.bf16 %v4016_v52, %v4016_v52 }
 0x730   : > { %3284 = vmatmul.mubr.msk.bf16.vlgmr.msra.gmra.mrb[16].mxu1 %vm465_vm2, %v1783_v41 }
 0x731   : > { %3312 = vmatprep.mubr.msk.f32.mxu1 %vm3589_vm1, %v3588_v4 }
 0x803   : > { %v4023_v40 = vpop.f32.mrb[16].mxu1 }
 0x804   : > { %1901 = vrot.lane.b32.xlu0 %v4023_v40, %s3590_s24  ;;  %v3285_v50 = vpop.f32.mrb[17].mxu1  ;;  %v2472_v58 = vrot.slane %v4023_v40, 5  ;;  %v2680_v33 = vrot.slane %v4023_v40, 7  ;;  %v2368_v6 = vrot.slane %v4023_v40, 4 }
 0x805   : > { %v1857_v49 = vpop.f32.mrb[18].mxu1 }
 0x806   : > { %v3286_v36 = vpop.f32.mrb[19].mxu1 }
 0x822   : > { %1860 = vxpose.xlu0.b32.start.end [1/1] (short) (narrow) %v4023_v40, 16 }
 0x84b   : > { %3449 = vset.pattern.permute.xlu0 %v3592_v57  ;;  %v2264_v57 = vrot.slane %v4023_v40, 3 }
 0x876   : > { %v1902_v53 = vpop.permute.xlu0 %1901 }
 0x8a2   : > { %v1876_v0 = vpop.trf.xlu0 }
 0x8a3   : > { %1937 = vperm.xlu1 %3448, %v1876_v0  }
 0x8a6   : > { %v1877_v54 = vpop.trf.xlu0 }
 0x8a7   : > { %3450 = vset.pattern.permute.xlu1 %v3591_v55  ;;  %1942 = vperm.xlu0 %3449, %v1877_v54  }
 0x8a8   : > { %2041 = vperm.xlu1 %3450, %v1876_v0  }
 0x8ab   : > { %3454 = vset.pattern.permute.xlu0 %v3596_v1 }
 0x8ac   : > { %3451 = vset.pattern.permute.xlu1 %v3594_v60  ;;  %2457 = vperm.xlu0 %3454, %v1876_v0  }
 0x8ad   : > { %2145 = vperm.xlu1 %3451, %v1876_v0  }
 0x8b0   : > { %3462 = vset.pattern.permute.xlu0 %v3598_v5 }
 0x8b1   : > { %3452 = vset.pattern.permute.xlu1 %v3593_v59  ;;  %2565 = vperm.xlu0 %3462, %v1877_v54  }
 0x8b2   : > { %2249 = vperm.xlu1 %3452, %v1876_v0  }
 0x8b5   : > { %3463 = vset.pattern.permute.xlu0 %v3600_v9 }
 0x8b6   : > { %3453 = vset.pattern.permute.xlu1 %v3595_v63  ;;  %2669 = vperm.xlu0 %3463, %v1877_v54  }
 0x8b7   : > { %2353 = vperm.xlu1 %3453, %v1876_v0  }
 0x8ba   : > { %2265 = vrot.lane.b32.xlu0 %v2264_v57, %s3599_s25 }
 0x8bb   : > { %3455 = vset.pattern.permute.xlu1 %v3598_v5  ;;  %v3080_v5 = vmul.f32 -1.442695, %v4002_v31 }
 0x8bc   : > { %2561 = vperm.xlu1 %3455, %v1876_v0  }
 0x8bd   : > { %3538 = vpow2.f32 %v3080_v5 }
 0x8be   : > { %2473 = vrot.lane.b32.xlu0 %v2472_v58, %s3599_s25 }
 0x8c0   : > { %3456 = vset.pattern.permute.xlu1 %v3591_v55  ;;  %v3067_v55 = vld [vmem:[%s4246_s6 + $0x1] ss:$0 sm:$0xff] }
 0x8c1   : > { %2045 = vperm.xlu1 %3456, %v1877_v54   ;;  %v1904_v56 = vadd.f32 %v3067_v55, %v1902_v53 }
 0x8c2   : > { %2681 = vrot.lane.b32.xlu0 %v2680_v33, %s3599_s25 }
 0x8c3   : > { %vm1905_vm8 = vcmp.gt.f32.partialorder %v1904_v56, 20.0 }
 0x8c5   : > { %3457 = vset.pattern.permute.xlu1 %v3594_v60  ;;  %v1906_v60 = vmin.f32 %v1904_v56, 20.0 }
 0x8c6   : > { %2149 = vperm.xlu1 %3457, %v1877_v54  }
 0x8c7   : > { %v1907_v62 = vmul.f32 1.442695, %v1906_v60 }
 0x8ca   : > { %3458 = vset.pattern.permute.xlu1 %v3593_v59  ;;  %v3539_v59 = vpop.eup %3538 }
 0x8cb   : > { %2253 = vperm.xlu1 %3458, %v1877_v54   ;;  %v2770_v61 = vadd.f32 1.0, %v3539_v59 }
 0x8cd   : > { %3540 = vrcp.f32 %v2770_v61 }
 0x8ce   : > { %3542 = vpow2.f32 %v1907_v62 }
 0x8cf   : > { %3459 = vset.pattern.permute.xlu1 %v3595_v63  ;;  %v2056_v63 = vrot.slane %v4023_v40, 1 }
 0x8d0   : > { %2357 = vperm.xlu1 %3459, %v1877_v54  }
 0x8d4   : > { %3460 = vset.pattern.permute.xlu1 %v3596_v1  ;;  %v2160_v1 = vrot.slane %v4023_v40, 2 }
 0x8d5   : > { %2461 = vperm.xlu1 %3460, %v1877_v54  }
 0x8d7   : > { %v3541_v7 = vpop.eup %3540 }
 0x8d8   : > { %v3543_v8 = vpop.eup %3542  ;;  %v2773_v43 = vmul.f32 %v3541_v7, %v4002_v31  ;;  %v4072_v31 = vld [vmem:[%s4247_s7 + $0x10] sm:$0xff] }
 0x8d9   : > { %1953 = vrot.lane.b32.xlu1 %v4023_v40, %s3599_s25  ;;  %v1909_v10 = vadd.f32 1.0, %v3543_v8  ;;  %v1912_v11 = vmul.f32 -0.5, %v3543_v8  ;;  %v1915_v13 = vand.u32 2147483647, %v3543_v8 }
 0x8da   : > { %3461 = vset.pattern.permute.xlu1 %v3600_v9  ;;  %v2576_v9 = vrot.slane %v4023_v40, 6 }
 0x8db   : > { %3544 = vlog2.f32 %v1909_v10  ;;  %v1913_v14 = vadd.f32 1.0, %v1912_v11  ;;  %vm1916_vm7 = vcmp.lt.f32.partialorder %v1915_v13, 0.0004427343 }
 0x8dd   : > { %2665 = vperm.xlu1 %3461, %v1876_v0   ;;  %v1914_v18 = vmul.f32 %v3543_v8, %v1913_v14 }
 0x8e1   : > { %2057 = vrot.lane.b32.xlu1 %v2056_v63, %s3599_s25 }
 0x8e5   : > { %2161 = vrot.lane.b32.xlu1 %v2160_v1, %s3599_s25  ;;  %v3545_v12 = vpop.eup %3544 }
 0x8e6   : > { %v1911_v17 = vmul.f32 0.6931472, %v3545_v12 }
 0x8e8   : > { %v1917_v20 = vsel %vm1916_vm7, %v1914_v18, %v1911_v17 }
 0x8e9   : > { %2369 = vrot.lane.b32.xlu1 %v2368_v6, %s3599_s25  ;;  %v4065_v24 = vsel %vm1905_vm8, %v1904_v56, %v1917_v20 }
 0x8ea   : > { %v1926_v26 = vrot.slane %v4065_v24, %v3742_v22  ;;  %v2031_v35 = vrot.slane %v4065_v24, %v3745_v23  ;;  %v2135_v39 = vrot.slane %v4065_v24, %v3751_v27  ;;  %v4088_v16 = vmul.f32 %v4065_v24, %v4016_v52 }
 0x8eb   : > { %v2239_v50 = vrot.slane %v4065_v24, %v3756_v30  ;;  %v2343_v60 = vrot.slane %v4065_v24, %v3848_v3  ;;  %v2447_v12 = vrot.slane %v4065_v24, %v3857_v25 }
 0x8ec   : > { %v1927_v32 = vmul.f32 %v4072_v31, %v1926_v26  ;;  %v1928_v38 = vmul.f32 %v4077_v29, %v1926_v26  ;;  %v2032_v28 = vmul.f32 %v4072_v31, %v2031_v35  ;;  %v2136_v42 = vmul.f32 %v4072_v31, %v2135_v39 }
 0x8ed   : > { %2577 = vrot.lane.b32.xlu1 %v2576_v9, %s3599_s25  ;;  %v1948_v45 = vrot.slane %v4088_v16, %v3742_v22  ;;  %v2240_v58 = vmul.f32 %v4072_v31, %v2239_v50  ;;  %v2051_v22 = vrot.slane %v4088_v16, %v3745_v23  ;;  %v2033_v63 = vmul.f32 %v4077_v29, %v2031_v35  ;;  %s462_s25 = scalar_lea.vmem %s4254_s14, %s3011_s15 }
 0x8ee   : > { %v1929_v34 = vmul.f32 1.442695, %v1927_v32  ;;  %v1931_v19 = vmul.f32 1.442695, %v1928_v38  ;;  %v2034_v37 = vmul.f32 1.442695, %v2032_v28  ;;  %v2344_v6 = vmul.f32 %v4072_v31, %v2343_v60 }
 0x8ef   : > { %v2138_v40 = vmul.f32 1.442695, %v2136_v42  ;;  %v2242_v61 = vmul.f32 1.442695, %v2240_v58  ;;  %v2036_v23 = vmul.f32 1.442695, %v2033_v63  ;;  %v2137_v9 = vmul.f32 %v4077_v29, %v2135_v39 }
 0x8f0   : > { %3546 = vpow2.f32 %v1929_v34  ;;  %v2155_v7 = vrot.slane %v4088_v16, %v3751_v27  ;;  %v2346_v11 = vmul.f32 1.442695, %v2344_v6  ;;  %v2241_v17 = vmul.f32 %v4077_v29, %v2239_v50 }
 0x8f1   : > { %2775 = vrot.lane.b32.xlu1 %v2773_v43, %s3601_s26  ;;  %3548 = vpow2.f32 %v1931_v19  ;;  %v2140_v13 = vmul.f32 1.442695, %v2137_v9  ;;  %v2448_v20 = vmul.f32 %v4072_v31, %v2447_v12  ;;  %v2259_v27 = vrot.slane %v4088_v16, %v3756_v30 }
 0x8f2   : > { %3550 = vpow2.f32 %v2034_v37  ;;  %v2244_v32 = vmul.f32 1.442695, %v2241_v17  ;;  %v2345_v34 = vmul.f32 %v4077_v29, %v2343_v60  ;;  %v2551_v37 = vrot.slane %v4065_v24, %v3868_v46 }
 0x8f3   : > { %3552 = vpow2.f32 %v2138_v40  ;;  %v2450_v28 = vmul.f32 1.442695, %v2448_v20  ;;  %v2363_v50 = vrot.slane %v4088_v16, %v3848_v3 }
 0x8f4   : > { %3554 = vpow2.f32 %v2242_v61  ;;  %v2348_v42 = vmul.f32 1.442695, %v2345_v34 }
 0x8f5   : > { %3556 = vpow2.f32 %v2036_v23 }
 0x8f6   : > { %3558 = vpow2.f32 %v2346_v11 }
 0x8f7   : > { %3560 = vpow2.f32 %v2140_v13 }
 0x8f8   : > { %3562 = vpow2.f32 %v2244_v32 }
 0x8f9   : > { %3564 = vpow2.f32 %v2450_v28  ;;  %v2571_v28 = vrot.slane %v4088_v16, %v3868_v46 }
 0x8fa   : > { %v3547_v44 = vpop.eup %3546  ;;  %3566 = vpow2.f32 %v2348_v42 }
 0x8fb   : > { %v3549_v47 = vpop.eup %3548  ;;  %v1933_v49 = vmul.f32 0.0, %v3547_v44 }
 0x8fc   : > { %v1934_v36 = vmul.f32 0.0, %v3549_v47  ;;  %v3551_v5 = vpop.eup %3550 }
 0x8fd   : > { %v3553_v8 = vpop.eup %3552 }
 0x8fe   : > { %v3555_v38 = vpop.eup %3554 }
 0x8ff   : > { %v3557_v39 = vpop.eup %3556 }
 0x900   : > { %v3559_v40 = vpop.eup %3558 }
 0x922   : > { %v1938_v21 = vpop.permute.xlu1 %1937 }
 0x923   : > { %v1949_v48 = vmul.f32 %v1948_v45, %v1938_v21 }
 0x925   : > { %v1951_v54 = vadd.f32 %v1949_v48, %v1933_v49  ;;  %v2449_v48 = vmul.f32 %v4077_v29, %v2447_v12 }
 0x926   : > { %v1943_v41 = vpop.permute.xlu0 %1942 }
 0x927   : > { %v1950_v53 = vmul.f32 %v1948_v45, %v1943_v41  ;;  %v2042_v0 = vpop.permute.xlu1 %2041  ;;  %v2038_v56 = vmul.f32 %v3551_v5, %v1951_v54  ;;  %v2552_v41 = vmul.f32 %v4072_v31, %v2551_v37 }
 0x928   : > { %v2052_v59 = vmul.f32 %v2051_v22, %v2042_v0 }
 0x929   : > { %v1952_v57 = vadd.f32 %v1950_v53, %v1934_v36  ;;  %v3561_v36 = vpop.eup %3560  ;;  %v2655_v53 = vrot.slane %v4065_v24, %v3880_v15 }
 0x92a   : > { %v4102_v62 = vadd.f32 %v2052_v59, %v2038_v56  ;;  %v3563_v3 = vpop.eup %3562 }
 0x92b   : > { %v3388_v33 = vpack.c.bf16 %v1952_v57, %v1951_v54  ;;  %v2458_v44 = vpop.permute.xlu0 %2457  ;;  %v2039_v30 = vmul.f32 %v3557_v39, %v1952_v57  ;;  %v2656_v61 = vmul.f32 %v4072_v31, %v2655_v53  ;;  %v2657_v6 = vmul.f32 %v4077_v29, %v2655_v53  ;;  %v3565_v9 = vpop.eup %3564 }
 0x92c   : > { %v2146_v55 = vpop.permute.xlu1 %2145  ;;  %v2142_v43 = vmul.f32 %v3553_v8, %v4102_v62  ;;  %v3567_v12 = vpop.eup %3566 }
 0x92d   : > { %3389 = vmatpush3.bf16.msra.mxu0 %v3388_v33  ;;  %v2156_v10 = vmul.f32 %v2155_v7, %v2146_v55  ;;  %v2452_v33 = vmul.f32 1.442695, %v2449_v48  ;;  %v2553_v55 = vmul.f32 %v4077_v29, %v2551_v37  ;;  %v2658_v11 = vmul.f32 1.442695, %v2656_v61  ;;  %v3482_v61 = vld [vmem:[%s4249_s9 + $0x30] sm:$0xff]  }
 0x92e   : > { %3390 = vmatprep.subr.bf16.mxu0 %v3597_v2  ;;  %v2660_v31 = vmul.f32 1.442695, %v2657_v6 }
 0x92f   : > { %v4112_v18 = vadd.f32 %v2156_v10, %v2142_v43  ;;  %3568 = vpow2.f32 %v2452_v33 }
 0x930   : > { %v2566_v56 = vpop.permute.xlu0 %2565 }
 0x931   : > { %v2250_v1 = vpop.permute.xlu1 %2249  ;;  %v2246_v19 = vmul.f32 %v3555_v38, %v4112_v18 }
 0x932   : > { %v2260_v35 = vmul.f32 %v2259_v27, %v2250_v1  ;;  %v2556_v1 = vmul.f32 1.442695, %v2553_v55 }
 0x934   : > { %v2262_v45 = vadd.f32 %v2260_v35, %v2246_v19 }
 0x935   : > { %v2670_v8 = vpop.permute.xlu0 %2669 }
 0x936   : > { %v2354_v14 = vpop.permute.xlu1 %2353  ;;  %v2350_v0 = vmul.f32 %v3559_v40, %v2262_v45 }
 0x937   : > { %v2364_v54 = vmul.f32 %v2363_v50, %v2354_v14 }
 0x939   : > { %v4135_v60 = vadd.f32 %v2364_v54, %v2350_v0 }
 0x93b   : > { %v4117_v26 = vpop.permute.xlu1 %2561  ;;  %v2454_v43 = vmul.f32 %v3565_v9, %v4135_v60 }
 0x940   : > { %v2046_v21 = vpop.permute.xlu1 %2045 }
 0x941   : > { %v2053_v47 = vmul.f32 %v2051_v22, %v2046_v21  ;;  %v2554_v22 = vmul.f32 1.442695, %v2552_v41  ;;  %v2572_v21 = vmul.f32 %v2571_v28, %v4117_v26  ;;  %v2675_v26 = vrot.slane %v4088_v16, %v3880_v15 }
 0x943   : > { %v4127_v49 = vadd.f32 %v2053_v47, %v2039_v30  ;;  %3570 = vpow2.f32 %v2554_v22  ;;  %v2573_v47 = vmul.f32 %v2571_v28, %v2566_v56 }
 0x944   : > { %3572 = vpow2.f32 %v2556_v1 }
 0x945   : > { %v2150_v57 = vpop.permute.xlu1 %2149  ;;  %v2143_v58 = vmul.f32 %v3561_v36, %v4127_v49  ;;  %3574 = vpow2.f32 %v2658_v11  ;;  %v2677_v36 = vmul.f32 %v2675_v26, %v2670_v8 }
 0x946   : > { %v2157_v5 = vmul.f32 %v2155_v7, %v2150_v57  ;;  %v2467_v7 = vrot.slane %v4088_v16, %v3857_v25  ;;  %3576 = vpow2.f32 %v2660_v31  ;;  %v3569_v25 = vpop.eup %3568 }
 0x948   : > { %v4133_v59 = vadd.f32 %v2157_v5, %v2143_v58  ;;  %v2468_v14 = vmul.f32 %v2467_v7, %v2458_v44 }
 0x94a   : > { %v2254_v24 = vpop.permute.xlu1 %2253  ;;  %v2247_v63 = vmul.f32 %v3563_v3, %v4133_v59  ;;  %v2470_v38 = vadd.f32 %v2468_v14, %v2454_v43  ;;  %v3394_v15 = vpack.c.bf16 %v4133_v59, %v4112_v18 }
 0x94b   : > { %v2261_v23 = vmul.f32 %v2259_v27, %v2254_v24  ;;  %v2266_v27 = vpop.permute.xlu0 %2265  ;;  %v3483_v24 = vld [vmem:[%s4249_s9 + $0x38] sm:$0xff]  }
 0x94d   : > { %v2263_v10 = vadd.f32 %v2261_v23, %v2247_v63  ;;  %v3571_v34 = vpop.eup %3570 }
 0x94e   : > { %v2558_v37 = vmul.f32 %v3571_v34, %v2470_v38  ;;  %v3573_v44 = vpop.eup %3572 }
 0x94f   : > { %v3397_v13 = vpack.c.bf16 %v2263_v10, %v2262_v45  ;;  %v2358_v17 = vpop.permute.xlu1 %2357  ;;  %v2351_v20 = vmul.f32 %v3567_v12, %v2263_v10  ;;  %v3391_v45 = vpack.c.bf16 %v4127_v49, %v4102_v62  ;;  %v3575_v46 = vpop.eup %3574 }
 0x950   : > { %v2365_v32 = vmul.f32 %v2363_v50, %v2358_v17  ;;  %v2574_v48 = vadd.f32 %v2572_v21, %v2558_v37  ;;  %v3577_v62 = vpop.eup %3576  ;;  %v2474_v53 = vpop.permute.xlu0 %2473 }
 0x951   : > { %3398 = vmatpush3.bf16.msra.mxu1 %v3397_v13 }
 0x952   : > { %v2367_v29 = vadd.f32 %v2365_v32, %v2351_v20  ;;  %3402 = vmatprep.subr.bf16.mxu1 %v3597_v2  ;;  %v2662_v0 = vmul.f32 %v3575_v46, %v2574_v48  ;;  %v3079_v32 = vld [vmem:[%s4248_s8 + $0x1] ss:$0 sm:$0xff] }
 0x954   : > { %v2462_v19 = vpop.permute.xlu1 %2461  ;;  %v2455_v35 = vmul.f32 %v3569_v25, %v2367_v29  ;;  %3313 = vmatmul.mubr.msk.f32.vlgmr.msra.gmra.mrb[20].mxu1 %vm758_vm5, %v2266_v27  ;;  %v3400_v5 = vpack.c.bf16 %v2367_v29, %v4135_v60  ;;  %v2682_v56 = vpop.permute.xlu0 %2681  ;;  %v3481_v60 = vld [vmem:[%s4249_s9 + $0x28] sm:$0xff]  }
 0x955   : > { %v2469_v39 = vmul.f32 %v2467_v7, %v2462_v19  ;;  %3326 = vmatprep.mubr.msk.f32.mxu1 %vm3589_vm1, %v3588_v4 }
 0x957   : > { %v2471_v42 = vadd.f32 %v2469_v39, %v2455_v35 }
 0x958   : > { %v1954_v30 = vpop.permute.xlu1 %1953 }
 0x959   : > { %v3403_v41 = vpack.c.bf16 %v2471_v42, %v2470_v38  ;;  %v2559_v40 = vmul.f32 %v3573_v44, %v2471_v42  ;;  %3292 = vmatmul.mubr.msk.f32.vlgmr.msra.gmra.mrb[16].mxu0 %vm758_vm5, %v1954_v30  ;;  %v2765_v38 = vmul.f32 %v3079_v32, %v4016_v52 }
 0x95a   : > { %3392 = vmatpush3.bf16.msra.mxu0 %v3391_v45  ;;  %3298 = vmatprep.mubr.msk.f32.mxu0 %vm3589_vm1, %v3588_v4 }
 0x95b   : > { %v2575_v50 = vadd.f32 %v2573_v47, %v2559_v40  ;;  %3404 = vmatpush3.bf16.msra.mxu1 %v3403_v41  ;;  %3393 = vmatprep.subr.bf16.mxu0 %v3597_v2 }
 0x95c   : > { %v2666_v49 = vpop.permute.xlu1 %2665  ;;  %3408 = vmatprep.subr.bf16.mxu1 %v3597_v2 }
 0x95d   : > { %v2663_v54 = vmul.f32 %v3577_v62, %v2575_v50  ;;  %v2676_v57 = vmul.f32 %v2675_v26, %v2666_v49  ;;  %v3406_v59 = vpack.c.bf16 %v2575_v50, %v2574_v48  ;;  %v3484_v48 = vld [vmem:[%s4252_s12] sm:$0xff]  }
 0x95e   : > { %3327 = vmatmul.mubr.msk.f32.vlgmr.msra.gmra.mrb[22].mxu1 %vm758_vm5, %v2474_v53  ;;  %v3094_v50 = vld [vmem:[%s4250_s10] ss:$0 sm:$0xff] }
 0x95f   : > { %v2678_v58 = vadd.f32 %v2676_v57, %v2662_v0  ;;  %v2679_v33 = vadd.f32 %v2677_v36, %v2663_v54  ;;  %3340 = vmatprep.mubr.msk.f32.mxu1 %vm3589_vm1, %v3588_v4  ;;  %v3095_v49 = vld [vmem:[%s4251_s11] ss:$0 sm:$0xff] }
 0x960   : > { %v2058_v16 = vpop.permute.xlu1 %2057 }
 0x961   : > { %v3409_v22 = vpack.c.bf16 %v2679_v33, %v2678_v58  ;;  %3299 = vmatmul.mubr.msk.f32.vlgmr.msra.gmra.mrb[18].mxu0 %vm758_vm5, %v2058_v16 }
 0x962   : > { %3395 = vmatpush3.bf16.msra.mxu0 %v3394_v15  ;;  %3305 = vmatprep.mubr.msk.f32.mxu0 %vm3589_vm1, %v3588_v4 }
 0x963   : > { %3410 = vmatpush3.bf16.msra.mxu1 %v3409_v22  ;;  %3399 = vmatprep.subr.bf16.mxu0 %v3597_v2 }
 0x964   : > { %v2162_v55 = vpop.permute.xlu1 %2161  ;;  %3355 = vmatprep.subr.bf16.mxu1 %v3588_v4 }
 0x965   : > { %3306 = vmatmul.mubr.msk.f32.vlgmr.msra.gmra.mrb[20].mxu0 %vm758_vm5, %v2162_v55 }
 0x966   : > { %3401 = vmatpush3.bf16.msra.mxu0 %v3400_v5  ;;  %3341 = vmatmul.mubr.msk.f32.vlgmr.msra.gmra.mrb[24].mxu1 %vm758_vm5, %v2682_v56 }
 0x967   : > { %3319 = vmatprep.mubr.msk.f32.mxu0 %vm3589_vm1, %v3588_v4  ;;  %3405 = vmatprep.subr.bf16.mxu0 %v3597_v2  ;;  %v3480_v2 = vld [vmem:[%s4249_s9 + $0x20] sm:$0xff]  }
 0x968   : > { %v2370_v18 = vpop.permute.xlu1 %2369  ;;  %3359 = vmatprep.mubr.msk.bf16.mxu1 %vm3589_vm1, %v3588_v4  ;;  %3356 = vmatpush3.bf16.msra.mxu1 %v3484_v48 }
 0x969   : > { %3320 = vmatmul.mubr.msk.f32.vlgmr.msra.gmra.mrb[22].mxu0 %vm758_vm5, %v2370_v18  ;;  %3357 = vmatprep.subr.bf16.mxu1 %v3588_v4 }
 0x96a   : > { %3407 = vmatpush3.bf16.msra.mxu0 %v3406_v59  ;;  %3333 = vmatprep.mubr.msk.f32.mxu0 %vm3589_vm1, %v3588_v4 }
 0x96b   : > { %3343 = vmatprep.subr.bf16.mxu0 %v3588_v4 }
 0x96c   : > { %v2578_v3 = vpop.permute.xlu1 %2577 }
 0x96d   : > { %3334 = vmatmul.mubr.msk.f32.vlgmr.msra.gmra.mrb[24].mxu0 %vm758_vm5, %v2578_v3 }
 0x96e   : > { %3351 = vmatprep.mubr.msk.bf16.mxu0 %vm3589_vm1, %v3588_v4  ;;  %3344 = vmatpush3.bf16.msra.mxu0 %v3480_v2 }
 0x96f   : > { %3345 = vmatprep.subr.bf16.mxu0 %v3588_v4 }
 0x970   : > { %v2776_v27 = vpop.permute.xlu1 %2775 }
 0x972   : > { %3346 = vmatpush3.bf16.msra.mxu0 %v3481_v60 }
 0x973   : > { %3347 = vmatprep.subr.bf16.mxu0 %v3588_v4 }
 0x976   : > { %3348 = vmatpush3.bf16.msra.mxu0 %v3482_v61 }
 0x977   : > { %3349 = vmatprep.subr.bf16.mxu0 %v3588_v4  ;;  %v3096_v4 = vld [vmem:[%s4253_s13] ss:$0 sm:$0xff] }
 0x97a   : > { %3350 = vmatpush3.bf16.msra.mxu0 %v3483_v24 }
 0xa27   : > { %v2335_v63 = vpop.f32.mrb[20].mxu1 }
 0xa28   : > { %2339 = vst.msk [vmem:[#allocation3 + $0x3] sm:$0x1] %vm831_vm6, %v2335_v63  ;;  %v3314_v1 = vpop.f32.mrb[21].mxu1 }
 0xa2c   : > { %v2023_v6 = vpop.f32.mrb[16].mxu0 }
 0xa2d   : > { %2027 = vst.msk [vmem:[#allocation3] sm:$0x1] %vm831_vm6, %v2023_v6  ;;  %v3293_v23 = vpop.f32.mrb[17].mxu0 }
 0xa31   : > { %v2543_v9 = vpop.f32.mrb[22].mxu1 }
 0xa32   : > { %2547 = vst.msk [vmem:[#allocation3 + $0x5] sm:$0x1] %vm831_vm6, %v2543_v9  ;;  %v3328_v7 = vpop.f32.mrb[23].mxu1 }
 0xa34   : > { %v2127_v8 = vpop.f32.mrb[18].mxu0 }
 0xa35   : > { %2131 = vst.msk [vmem:[#allocation3 + $0x1] sm:$0x1] %vm831_vm6, %v2127_v8  ;;  %v3300_v43 = vpop.f32.mrb[19].mxu0 }
 0xa38   : > { %v2231_v10 = vpop.f32.mrb[20].mxu0 }
 0xa39   : > { %2235 = vst.msk [vmem:[#allocation3 + $0x2] sm:$0x1] %vm831_vm6, %v2231_v10  ;;  %v3307_v11 = vpop.f32.mrb[21].mxu0  ;;  %v2751_v12 = vpop.f32.mrb[24].mxu1 }
 0xa3a   : > { %2755 = vst.msk [vmem:[#allocation3 + $0x7] sm:$0x1] %vm831_vm6, %v2751_v12  ;;  %v3342_v31 = vpop.f32.mrb[25].mxu1 }
 0xa3c   : > { %v2439_v14 = vpop.f32.mrb[22].mxu0 }
 0xa3d   : > { %2443 = vst.msk [vmem:[#allocation3 + $0x4] sm:$0x1] %vm831_vm6, %v2439_v14  ;;  %v3321_v13 = vpop.f32.mrb[23].mxu0 }
 0xa40   : > { %v2647_v17 = vpop.f32.mrb[24].mxu0 }
 0xa41   : > { %2651 = vst.msk [vmem:[#allocation3 + $0x6] sm:$0x1] %vm831_vm6, %v2647_v17  ;;  %v3335_v20 = vpop.f32.mrb[25].mxu0 }
 0xa48   : > { %v2756_v29 = vld [vmem:[#allocation3] sm:$0xff] }
 0xa49   : > { %v2766_v25 = vadd.f32 %v2765_v38, %v2756_v29 }
 0xa4b   : > { %v2778_v34 = vmul.f32 %v2776_v27, %v2766_v25 }
 0xa4d   : > { %v2779_v19 = vpack.c.bf16 %v2778_v34, %v2778_v34 }
 0xa4f   : > { %3352 = vmatmul.mubr.msk.bf16.vlgmr.msra.gmra.mrb[28].mxu0 %vm465_vm2, %v2779_v19 }
 0xb22   : > { %v2850_v35 = vpop.f32.mrb[28].mxu0 }
 0xb23   : > { %v2851_v28 = vadd.f32 %v2850_v35, %v3966_v51  ;;  %v3353_v37 = vpop.f32.mrb[29].mxu0  ;;  %v3485_v51 = vld [vmem:[%s4252_s12 + $0x8] sm:$0xff]  }
 0xb24   : > { %v2853_v39 = vpop.f32.mrb[30].mxu0  ;;  %3358 = vmatpush3.bf16.msra.mxu1 %v3485_v51 }
 0xb25   : > { %v3354_v21 = vpop.f32.mrb[31].mxu0  ;;  %v2856_v42 = vsel %vm468_vm0, %v2851_v28, 0.0 }
 0xb26   : > { %2857 = vadd.xlane.f32.xlu0 %v2856_v42 }
 0xbb3   : > { %v2858_v44 = vpop.xlane.xlu0 %2857 }
 0xbb4   : > { %v2859_v45 = vmul.f32 0.03125, %v2858_v44 }
 0xbb6   : > { %v2860_v30 = vsub.f32 %v2851_v28, %v2859_v45 }
 0xbb8   : > { %v2861_v52 = vmul.f32 %v2860_v30, %v2860_v30 }
 0xbba   : > { %v2862_v47 = vsel %vm468_vm0, %v2861_v52, 0.0 }
 0xbbb   : > { %2863 = vadd.xlane.f32.xlu1 %v2862_v47 }
 0xc48   : > { %v2864_v41 = vpop.xlane.xlu1 %2863 }
 0xc49   : > { %v2865_v40 = vmul.f32 0.03125, %v2864_v41 }
 0xc4b   : > { %v2866_v46 = vadd.f32 1e-05, %v2865_v40 }
 0xc4d   : > { %3578 = vrsqrt.f32 %v2866_v46 }
 0xc57   : > { %v3579_v26 = vpop.eup %3578 }
 0xc58   : > { %v2868_v62 = vmul.f32 %v3579_v26, %v2860_v30 }
 0xc5a   : > { %v2876_v36 = vmul.f32 %v3094_v50, %v2868_v62 }
 0xc5c   : > { %v2884_v53 = vadd.f32 %v3095_v49, %v2876_v36 }
 0xc5e   : > { %v2885_v0 = vpack.c.bf16 %v2884_v53, %v2884_v53 }
 0xc60   : > { %3360 = vmatmul.mubr.msk.bf16.vlgmr.msra.gmra.mrb[28].mxu1 %vm468_vm0, %v2885_v0 }
 0xd33   : > { %v2946_v54 = vpop.f32.mrb[28].mxu1 }
 0xd34   : > { %v2947_v57 = vadd.f32 %v3096_v4, %v2946_v54  ;;  %v3361_v58 = vpop.f32.mrb[29].mxu1 }
 0xd35   : > { %v2949_v33 = vpop.f32.mrb[30].mxu1 }
 0xd36   : > { %2952 = vst [vmem:[%s462_s25] sm:$0xff] %v2947_v57  ;;  %v3362_v15 = vpop.f32.mrb[31].mxu1 }
 0xd37 PF: > { %s24_s29 = sadd.s32 1, %s3586_s29  }
 0xd38   : > { %p21_p4 = scmp.ge.s32.totalorder %s24_s29, 4  }
 0xd3a   :  { %23 = sbr.rel (!%p21_p4) target bundleno = 1 (0x1), region = 115 }

</bundles_post_ra>
